<compile_context>
chip_gen: v6e
topology: v6e:2x2x1
jax: 0.10.0
libtpu: 0.0.40
codegen_flags: <defaults>
</compile_context>

<pallas_src>
import functools

import jax
import jax.numpy as jnp
from jax.experimental import pallas as pl
from jax.experimental.pallas import tpu as pltpu

BN_EPS = 1e-5


def _conv3x3_flat(body, top, bot, w_ref, W, cdt):
    """3x3 'same' conv in channels-first, row-flattened (spatial-on-lane) layout.

    body: (Cin, S) f32, S = rows*W (image rows flattened onto lanes)
    top/bot: (Cin, W) f32 — the row just above body's first row / just below
             body's last row (zeros at image boundaries).
    w_ref:  (3, Cout, 3*Cin) ref in the matmul dtype, tap order [ky][kx*Cin+i].
    Returns (Cout, S) f32 (MXU accumulation in f32).
    """
    Cin, S = body.shape
    col = jax.lax.broadcasted_iota(jnp.int32, (1, S), 1) % W
    zcol = jnp.zeros((Cin, 1), body.dtype)

    # Row-shifted slabs (shift by exactly W lanes, fill from the halo rows).
    up = jnp.concatenate([top, body[:, :S - W]], axis=1)    # reads row h-1
    down = jnp.concatenate([body[:, W:], bot], axis=1)      # reads row h+1

    acc = None
    for ky, slab in enumerate((up, body, down)):
        # Column-shifted taps with zero fill at the left/right image edges.
        left = jnp.where(col == 0, 0.0,
                         jnp.concatenate([zcol, slab[:, :S - 1]], axis=1))
        right = jnp.where(col == W - 1, 0.0,
                          jnp.concatenate([slab[:, 1:], zcol], axis=1))
        patches = jnp.concatenate([left, slab, right], axis=0).astype(cdt)
        part = jax.lax.dot_general(
            w_ref[ky], patches,
            dimension_numbers=(((1,), (0,)), ((), ())),
            preferred_element_type=jnp.float32)              # (Cout, S) f32
        acc = part if acc is None else acc + part
    return acc


def basic_block_kernel(xb_ref, xt_ref, xd_ref, w1_ref, w2_ref, bn_ref, out_ref):
    # xb_ref: (C, S) row slab of x (S = row_tile*W), also the residual.
    # xt_ref / xd_ref: (C, 8, W) 8-row aligned chunks holding the 2 halo rows
    #                  above / below the tile.
    # w1_ref / w2_ref: (3, C, 3*C) fused conv taps.  bn_ref: (4, C, 1) folded BN.
    C, S = xb_ref.shape
    W = xt_ref.shape[-1]
    S1 = S + 2 * W                       # conv1 extent: row_tile + 2 rows
    cdt = w1_ref.dtype

    r = pl.program_id(1)
    last = pl.num_programs(1) - 1
    x_body = xb_ref[...]                 # (C, S) f32

    # Two halo rows above / below the tile: last/first rows of the aligned
    # chunks, replaced by the zero conv-padding row at image boundaries.
    row_m2 = jnp.where(r == 0, 0.0, xt_ref[:, 6, :])
    row_m1 = jnp.where(r == 0, 0.0, xt_ref[:, 7, :])
    row_p0 = jnp.where(r == last, 0.0, xd_ref[:, 0, :])
    row_p1 = jnp.where(r == last, 0.0, xd_ref[:, 1, :])

    # conv1 -> bn1 -> relu evaluated on row_tile+2 rows so conv2's halo rows
    # can be recomputed locally (no streaming of the intermediate).
    body1 = jnp.concatenate([row_m1, x_body, row_p0], axis=1)        # (C, S1)
    acc1 = _conv3x3_flat(body1, row_m2, row_p1, w1_ref, W, cdt)
    out1 = jnp.maximum(acc1 * bn_ref[0] + bn_ref[1], 0.0)            # (C, S1) f32

    # conv2 -> bn2 -> +residual -> relu over the central row_tile rows.
    # At image boundaries conv2's halo row is the zero padding row, not the
    # (locally computed, out-of-image) out1 row.
    top1 = jnp.where(r == 0, 0.0, out1[:, :W])
    bot1 = jnp.where(r == last, 0.0, out1[:, S1 - W:])
    acc2 = _conv3x3_flat(out1[:, W:W + S], top1, bot1, w2_ref, W, cdt)
    out2 = acc2 * bn_ref[2] + bn_ref[3] + x_body                     # (C, S) f32
    out_ref[...] = jnp.maximum(out2, 0.0).astype(out_ref.dtype)


@functools.partial(jax.jit,
                   static_argnames=("compute_dtype", "out_dtype", "row_tile"))
def basic_block_forward(x, w1, g1, beta1, rm1, rv1, w2, g2, beta2, rm2, rv2,
                        compute_dtype=jnp.bfloat16, out_dtype=jnp.float32,
                        row_tile=8):
    """x: (N, C, H, W) float32 NCHW; conv weights in PyTorch OIHW layout."""
    N, C, H, W = x.shape
    th = row_tile
    if (H % 8) or (th % 8) or (H % th):
        raise ValueError("H and row_tile must be multiples of 8, row_tile | H")
    R = H // th
    S = th * W
    if th != H and S % 128:
        raise ValueError("row_tile * W must be a multiple of 128 "
                         "(or use row_tile == H)")

    # ---- glue: FREE reshape (no transpose), BN folding, fused tap weights ----
    x_flat = x.reshape(N, C, H * W)

    inv1 = g1 * jax.lax.rsqrt(rv1 + BN_EPS)
    inv2 = g2 * jax.lax.rsqrt(rv2 + BN_EPS)
    bn = jnp.stack([inv1, beta1 - rm1 * inv1,
                    inv2, beta2 - rm2 * inv2]).reshape(4, C, 1).astype(jnp.float32)

    def fuse_w(w):   # OIHW -> (ky, Cout, kx*Cin) in the matmul dtype
        return (jnp.transpose(w, (2, 0, 3, 1))
                .reshape(3, C, 3 * C).astype(compute_dtype))

    tb = th // 8                        # row-tile size in 8-row blocks
    const = lambda n, r: (0, 0, 0)

    out_flat = pl.pallas_call(
        basic_block_kernel,
        out_shape=jax.ShapeDtypeStruct((N, C, H * W), out_dtype),
        grid_spec=pltpu.PrefetchScalarGridSpec(
            num_scalar_prefetch=0,
            grid=(N, R),
            in_specs=[
                # row slab of x (lane-dense last dim; also the residual)
                pl.BlockSpec((pl.Squeezed(), C, S), lambda n, r: (n, 0, r)),
                # 8-row aligned chunk whose last 2 rows are the top halo
                pl.BlockSpec((pl.Squeezed(), C, 8, W),
                             lambda n, r: (n, 0, jnp.maximum(r * tb - 1, 0), 0)),
                # 8-row aligned chunk whose first 2 rows are the bottom halo
                pl.BlockSpec((pl.Squeezed(), C, 8, W),
                             lambda n, r: (n, 0,
                                           jnp.minimum((r + 1) * tb,
                                                       H // 8 - 1), 0)),
                # constant operands: single-buffered
                pl.BlockSpec((3, C, 3 * C), const, pipeline_mode=pl.Buffered(1)),
                pl.BlockSpec((3, C, 3 * C), const, pipeline_mode=pl.Buffered(1)),
                pl.BlockSpec((4, C, 1), const, pipeline_mode=pl.Buffered(1)),
            ],
            out_specs=pl.BlockSpec((pl.Squeezed(), C, S), lambda n, r: (n, 0, r)),
        ),
        compiler_params=pltpu.CompilerParams(
            dimension_semantics=("parallel", "parallel"),
            vmem_limit_bytes=48 * 1024 * 1024),
    )(x_flat, x, x, fuse_w(w1), fuse_w(w2), bn)

    return out_flat.reshape(N, C, H, W)   # free reshape back to NCHW


def _reference(x, w1, g1, beta1, rm1, rv1, w2, g2, beta2, rm2, rv2):
    """Plain-JAX f32 reference mirroring the PyTorch module (NCHW / OIHW)."""
    def conv(v, w):
        return jax.lax.conv_general_dilated(
            v, w, window_strides=(1, 1), padding=((1, 1), (1, 1)),
            dimension_numbers=("NCHW", "OIHW", "NCHW"))

    def bn(v, g, b, rm, rv):
        sh = (1, -1, 1, 1)
        return ((v - rm.reshape(sh)) / jnp.sqrt(rv.reshape(sh) + BN_EPS)
                * g.reshape(sh) + b.reshape(sh))

    out = jnp.maximum(bn(conv(x, w1), g1, beta1, rm1, rv1), 0.0)
    out = bn(conv(out, w2), g2, beta2, rm2, rv2)
    return jnp.maximum(out + x, 0.0)


if __name__ == "__main__":
    # Small but HRNet-representative shapes (BasicBlock widths are 32/48/64..):
    # C = 32 gives a realistic per-ky contraction depth K = 3*C = 96, and
    # row_tile=8, W=16 gives lane-dense (128-wide) spatial blocks.
    N, C, H, W = 2, 32, 16, 16

    key = jax.random.PRNGKey(0)
    ks = jax.random.split(key, 11)
    x = jax.random.normal(ks[0], (N, C, H, W), jnp.float32)

    wscale = 0.06
    w1 = wscale * jax.random.normal(ks[1], (C, C, 3, 3), jnp.float32)
    w2 = wscale * jax.random.normal(ks[2], (C, C, 3, 3), jnp.float32)
    g1 = 1.0 + 0.05 * jax.random.normal(ks[3], (C,), jnp.float32)
    beta1 = 0.05 * jax.random.normal(ks[4], (C,), jnp.float32)
    rm1 = 0.05 * jax.random.normal(ks[5], (C,), jnp.float32)
    rv1 = 1.0 + 0.1 * jax.random.uniform(ks[6], (C,), jnp.float32)
    g2 = 1.0 + 0.05 * jax.random.normal(ks[7], (C,), jnp.float32)
    beta2 = 0.05 * jax.random.normal(ks[8], (C,), jnp.float32)
    rm2 = 0.05 * jax.random.normal(ks[9], (C,), jnp.float32)
    rv2 = 1.0 + 0.1 * jax.random.uniform(ks[10], (C,), jnp.float32)

    args = (x, w1, g1, beta1, rm1, rv1, w2, g2, beta2, rm2, rv2)
    ref = _reference(*args)

    # Exact path: f32 matmul operands, row-tiled (grid = (N, H//8)).
    out_f32 = jax.block_until_ready(
        basic_block_forward(*args, compute_dtype=jnp.float32, row_tile=8))
    assert out_f32.shape == (N, C, H, W)
    assert jnp.allclose(out_f32, ref, atol=1e-4, rtol=1e-4), "f32 row-tiled mismatch"

    # Exact path, single tile per image (exercises the image-boundary halos).
    out_full = jax.block_until_ready(
        basic_block_forward(*args, compute_dtype=jnp.float32, row_tile=H))
    assert jnp.allclose(out_full, ref, atol=1e-4, rtol=1e-4), "f32 full-tile mismatch"

    # Performance path: bf16 MXU operands, f32 accumulation / elementwise.
    out_bf16 = jax.block_until_ready(
        basic_block_forward(*args, compute_dtype=jnp.bfloat16, row_tile=8))
    assert out_bf16.shape == (N, C, H, W)
    assert jnp.allclose(out_bf16, ref, atol=1e-1, rtol=1e-1), "bf16 mismatch"

    print("KERNEL_OK")
</pallas_src>

<mosaic_0001>
module attributes {stable_mosaic.version = 11 : i64} {
  func.func @basic_block_kernel(%arg0: i32, %arg1: i32, %arg2: memref<1x32x128xf32, #tpu.memory_space<vmem>>, %arg3: memref<1x32x8x16xf32, #tpu.memory_space<vmem>>, %arg4: memref<1x32x8x16xf32, #tpu.memory_space<vmem>>, %arg5: memref<3x32x96xf32, #tpu.memory_space<vmem>>, %arg6: memref<3x32x96xf32, #tpu.memory_space<vmem>>, %arg7: memref<4x32x1xf32, #tpu.memory_space<vmem>>, %arg8: memref<1x32x128xf32, #tpu.memory_space<vmem>>) attributes {dimension_semantics = [#tpu.dimension_semantics<parallel>, #tpu.dimension_semantics<parallel>], iteration_bounds = array<i64: 2, 2>, scalar_prefetch = 0 : i64, scratch_operands = 0 : i64, tpu.core_type = #tpu.core_type<tc>, window_params = [{transform_indices = @transform_0, window_bounds = array<i64: 1, 32, 128>}, {transform_indices = @transform_1, window_bounds = array<i64: 1, 32, 8, 16>}, {transform_indices = @transform_2, window_bounds = array<i64: 1, 32, 8, 16>}, {pipeline_mode = #tpu.pipeline_mode<synchronous>, transform_indices = @transform_3, window_bounds = array<i64: 3, 32, 96>}, {pipeline_mode = #tpu.pipeline_mode<synchronous>, transform_indices = @transform_4, window_bounds = array<i64: 3, 32, 96>}, {pipeline_mode = #tpu.pipeline_mode<synchronous>, transform_indices = @transform_5, window_bounds = array<i64: 4, 32, 1>}, {transform_indices = @transform_6, window_bounds = array<i64: 1, 32, 128>}]} {
    %c0 = arith.constant 0 : index
    %c0_0 = arith.constant 0 : index
    %c0_1 = arith.constant 0 : index
    %0 = vector.load %arg2[%c0, %c0_0, %c0_1] : memref<1x32x128xf32, #tpu.memory_space<vmem>>, vector<1x32x128xf32>
    %1 = vector.shape_cast %0 : vector<1x32x128xf32> to vector<32x128xf32>
    %c0_i32 = arith.constant 0 : i32
    %2 = arith.cmpi eq, %arg1, %c0_i32 : i32
    %c0_2 = arith.constant 0 : index
    %c0_3 = arith.constant 0 : index
    %c6 = arith.constant 6 : index
    %c0_4 = arith.constant 0 : index
    %3 = vector.load %arg3[%c0_2, %c0_3, %c6, %c0_4] : memref<1x32x8x16xf32, #tpu.memory_space<vmem>>, vector<1x32x1x16xf32>
    %4 = vector.shape_cast %3 : vector<1x32x1x16xf32> to vector<32x16xf32>
    %cst = arith.constant 0.000000e+00 : f32
    %5 = vector.broadcast %cst : f32 to vector<32x16xf32>
    %6 = arith.select %2, %5, %4 : vector<32x16xf32>
    %c0_i32_5 = arith.constant 0 : i32
    %7 = arith.cmpi eq, %arg1, %c0_i32_5 : i32
    %c0_6 = arith.constant 0 : index
    %c0_7 = arith.constant 0 : index
    %c7 = arith.constant 7 : index
    %c0_8 = arith.constant 0 : index
    %8 = vector.load %arg3[%c0_6, %c0_7, %c7, %c0_8] : memref<1x32x8x16xf32, #tpu.memory_space<vmem>>, vector<1x32x1x16xf32>
    %9 = vector.shape_cast %8 : vector<1x32x1x16xf32> to vector<32x16xf32>
    %cst_9 = arith.constant 0.000000e+00 : f32
    %10 = vector.broadcast %cst_9 : f32 to vector<32x16xf32>
    %11 = arith.select %7, %10, %9 : vector<32x16xf32>
    %c1_i32 = arith.constant 1 : i32
    %12 = arith.cmpi eq, %arg1, %c1_i32 : i32
    %c0_10 = arith.constant 0 : index
    %c0_11 = arith.constant 0 : index
    %c0_12 = arith.constant 0 : index
    %c0_13 = arith.constant 0 : index
    %13 = vector.load %arg4[%c0_10, %c0_11, %c0_12, %c0_13] : memref<1x32x8x16xf32, #tpu.memory_space<vmem>>, vector<1x32x1x16xf32>
    %14 = vector.shape_cast %13 : vector<1x32x1x16xf32> to vector<32x16xf32>
    %cst_14 = arith.constant 0.000000e+00 : f32
    %15 = vector.broadcast %cst_14 : f32 to vector<32x16xf32>
    %16 = arith.select %12, %15, %14 : vector<32x16xf32>
    %c1_i32_15 = arith.constant 1 : i32
    %17 = arith.cmpi eq, %arg1, %c1_i32_15 : i32
    %c0_16 = arith.constant 0 : index
    %c0_17 = arith.constant 0 : index
    %c1 = arith.constant 1 : index
    %c0_18 = arith.constant 0 : index
    %18 = vector.load %arg4[%c0_16, %c0_17, %c1, %c0_18] : memref<1x32x8x16xf32, #tpu.memory_space<vmem>>, vector<1x32x1x16xf32>
    %19 = vector.shape_cast %18 : vector<1x32x1x16xf32> to vector<32x16xf32>
    %cst_19 = arith.constant 0.000000e+00 : f32
    %20 = vector.broadcast %cst_19 : f32 to vector<32x16xf32>
    %21 = arith.select %17, %20, %19 : vector<32x16xf32>
    %22 = tpu.concatenate %11, %1, %16 in 1 : vector<32x16xf32>, vector<32x128xf32>, vector<32x16xf32> -> vector<32x160xf32>
    %23 = tpu.iota {dimensions = array<i32: 1>} : vector<1x160xi32>
    %c16_i32 = arith.constant 16 : i32
    %c0_i32_20 = arith.constant 0 : i32
    %24 = arith.cmpi eq, %c16_i32, %c0_i32_20 : i32
    %c1_i32_21 = arith.constant 1 : i32
    %25 = arith.select %24, %c1_i32_21, %c16_i32 : i32
    %26 = vector.broadcast %25 : i32 to vector<1x160xi32>
    %27 = arith.remsi %23, %26 : vector<1x160xi32>
    %c0_i32_22 = arith.constant 0 : i32
    %28 = vector.broadcast %c0_i32_22 : i32 to vector<1x160xi32>
    %29 = arith.cmpi ne, %27, %28 : vector<1x160xi32>
    %c0_i32_23 = arith.constant 0 : i32
    %30 = vector.broadcast %c0_i32_23 : i32 to vector<1x160xi32>
    %31 = arith.cmpi slt, %27, %30 : vector<1x160xi32>
    %c0_i32_24 = arith.constant 0 : i32
    %32 = arith.cmpi slt, %25, %c0_i32_24 : i32
    %33 = vector.broadcast %32 : i1 to vector<1x160xi1>
    %34 = vector.broadcast %33 : vector<1x160xi1> to vector<1x160xi1>
    %35 = arith.xori %31, %34 : vector<1x160xi1>
    %36 = arith.andi %35, %29 : vector<1x160xi1>
    %37 = vector.broadcast %25 : i32 to vector<1x160xi32>
    %38 = arith.addi %27, %37 : vector<1x160xi32>
    %39 = arith.select %36, %38, %27 : vector<1x160xi1>, vector<1x160xi32>
    %cst_25 = arith.constant 0.000000e+00 : f32
    %40 = vector.broadcast %cst_25 : f32 to vector<32x1xf32>
    %41 = vector.extract_strided_slice %22 {offsets = [0, 0], sizes = [32, 144], strides = [1, 1]} : vector<32x160xf32> to vector<32x144xf32>
    %42 = tpu.concatenate %6, %41 in 1 : vector<32x16xf32>, vector<32x144xf32> -> vector<32x160xf32>
    %43 = vector.extract_strided_slice %22 {offsets = [0, 16], sizes = [32, 144], strides = [1, 1]} : vector<32x160xf32> to vector<32x144xf32>
    %44 = tpu.concatenate %43, %21 in 1 : vector<32x144xf32>, vector<32x16xf32> -> vector<32x160xf32>
    %c0_i32_26 = arith.constant 0 : i32
    %45 = vector.broadcast %c0_i32_26 : i32 to vector<1x160xi32>
    %46 = arith.cmpi eq, %39, %45 : vector<1x160xi32>
    %47 = vector.extract_strided_slice %42 {offsets = [0, 0], sizes = [32, 159], strides = [1, 1]} : vector<32x160xf32> to vector<32x159xf32>
    %48 = tpu.concatenate %40, %47 in 1 : vector<32x1xf32>, vector<32x159xf32> -> vector<32x160xf32>
    %cst_27 = arith.constant 0.000000e+00 : f32
    %49 = vector.shape_cast %46 : vector<1x160xi1> to vector<1x160xi1>
    %50 = vector.broadcast %49 : vector<1x160xi1> to vector<32x160xi1>
    %51 = vector.broadcast %cst_27 : f32 to vector<32x160xf32>
    %52 = arith.select %50, %51, %48 : vector<32x160xi1>, vector<32x160xf32>
    %c15_i32 = arith.constant 15 : i32
    %53 = vector.broadcast %c15_i32 : i32 to vector<1x160xi32>
    %54 = arith.cmpi eq, %39, %53 : vector<1x160xi32>
    %55 = vector.extract_strided_slice %42 {offsets = [0, 1], sizes = [32, 159], strides = [1, 1]} : vector<32x160xf32> to vector<32x159xf32>
    %56 = tpu.concatenate %55, %40 in 1 : vector<32x159xf32>, vector<32x1xf32> -> vector<32x160xf32>
    %cst_28 = arith.constant 0.000000e+00 : f32
    %57 = vector.shape_cast %54 : vector<1x160xi1> to vector<1x160xi1>
    %58 = vector.broadcast %57 : vector<1x160xi1> to vector<32x160xi1>
    %59 = vector.broadcast %cst_28 : f32 to vector<32x160xf32>
    %60 = arith.select %58, %59, %56 : vector<32x160xi1>, vector<32x160xf32>
    %61 = tpu.concatenate %52, %42, %60 in 0 : vector<32x160xf32>, vector<32x160xf32>, vector<32x160xf32> -> vector<96x160xf32>
    %c0_29 = arith.constant 0 : index
    %c0_30 = arith.constant 0 : index
    %c0_31 = arith.constant 0 : index
    %62 = vector.load %arg5[%c0_29, %c0_30, %c0_31] : memref<3x32x96xf32, #tpu.memory_space<vmem>>, vector<1x32x96xf32>
    %63 = vector.shape_cast %62 : vector<1x32x96xf32> to vector<32x96xf32>
    %cst_32 = arith.constant dense<0.000000e+00> : vector<32x160xf32>
    %64 = tpu.matmul %63, %61, %cst_32 {dimension_numbers = #tpu.dot_dimension_numbers<[1], [0], [0], [1], [0, 0, 1, 1], [], []>} : vector<32x96xf32>, vector<96x160xf32>, vector<32x160xf32> -> vector<32x160xf32>
    %c0_i32_33 = arith.constant 0 : i32
    %65 = vector.broadcast %c0_i32_33 : i32 to vector<1x160xi32>
    %66 = arith.cmpi eq, %39, %65 : vector<1x160xi32>
    %67 = vector.extract_strided_slice %22 {offsets = [0, 0], sizes = [32, 159], strides = [1, 1]} : vector<32x160xf32> to vector<32x159xf32>
    %68 = tpu.concatenate %40, %67 in 1 : vector<32x1xf32>, vector<32x159xf32> -> vector<32x160xf32>
    %cst_34 = arith.constant 0.000000e+00 : f32
    %69 = vector.shape_cast %66 : vector<1x160xi1> to vector<1x160xi1>
    %70 = vector.broadcast %69 : vector<1x160xi1> to vector<32x160xi1>
    %71 = vector.broadcast %cst_34 : f32 to vector<32x160xf32>
    %72 = arith.select %70, %71, %68 : vector<32x160xi1>, vector<32x160xf32>
    %c15_i32_35 = arith.constant 15 : i32
    %73 = vector.broadcast %c15_i32_35 : i32 to vector<1x160xi32>
    %74 = arith.cmpi eq, %39, %73 : vector<1x160xi32>
    %75 = vector.extract_strided_slice %22 {offsets = [0, 1], sizes = [32, 159], strides = [1, 1]} : vector<32x160xf32> to vector<32x159xf32>
    %76 = tpu.concatenate %75, %40 in 1 : vector<32x159xf32>, vector<32x1xf32> -> vector<32x160xf32>
    %cst_36 = arith.constant 0.000000e+00 : f32
    %77 = vector.shape_cast %74 : vector<1x160xi1> to vector<1x160xi1>
    %78 = vector.broadcast %77 : vector<1x160xi1> to vector<32x160xi1>
    %79 = vector.broadcast %cst_36 : f32 to vector<32x160xf32>
    %80 = arith.select %78, %79, %76 : vector<32x160xi1>, vector<32x160xf32>
    %81 = tpu.concatenate %72, %22, %80 in 0 : vector<32x160xf32>, vector<32x160xf32>, vector<32x160xf32> -> vector<96x160xf32>
    %c1_37 = arith.constant 1 : index
    %c0_38 = arith.constant 0 : index
    %c0_39 = arith.constant 0 : index
    %82 = vector.load %arg5[%c1_37, %c0_38, %c0_39] : memref<3x32x96xf32, #tpu.memory_space<vmem>>, vector<1x32x96xf32>
    %83 = vector.shape_cast %82 : vector<1x32x96xf32> to vector<32x96xf32>
    %cst_40 = arith.constant dense<0.000000e+00> : vector<32x160xf32>
    %84 = tpu.matmul %83, %81, %cst_40 {dimension_numbers = #tpu.dot_dimension_numbers<[1], [0], [0], [1], [0, 0, 1, 1], [], []>} : vector<32x96xf32>, vector<96x160xf32>, vector<32x160xf32> -> vector<32x160xf32>
    %85 = arith.addf %64, %84 : vector<32x160xf32>
    %c0_i32_41 = arith.constant 0 : i32
    %86 = vector.broadcast %c0_i32_41 : i32 to vector<1x160xi32>
    %87 = arith.cmpi eq, %39, %86 : vector<1x160xi32>
    %88 = vector.extract_strided_slice %44 {offsets = [0, 0], sizes = [32, 159], strides = [1, 1]} : vector<32x160xf32> to vector<32x159xf32>
    %89 = tpu.concatenate %40, %88 in 1 : vector<32x1xf32>, vector<32x159xf32> -> vector<32x160xf32>
    %cst_42 = arith.constant 0.000000e+00 : f32
    %90 = vector.shape_cast %87 : vector<1x160xi1> to vector<1x160xi1>
    %91 = vector.broadcast %90 : vector<1x160xi1> to vector<32x160xi1>
    %92 = vector.broadcast %cst_42 : f32 to vector<32x160xf32>
    %93 = arith.select %91, %92, %89 : vector<32x160xi1>, vector<32x160xf32>
    %c15_i32_43 = arith.constant 15 : i32
    %94 = vector.broadcast %c15_i32_43 : i32 to vector<1x160xi32>
    %95 = arith.cmpi eq, %39, %94 : vector<1x160xi32>
    %96 = vector.extract_strided_slice %44 {offsets = [0, 1], sizes = [32, 159], strides = [1, 1]} : vector<32x160xf32> to vector<32x159xf32>
    %97 = tpu.concatenate %96, %40 in 1 : vector<32x159xf32>, vector<32x1xf32> -> vector<32x160xf32>
    %cst_44 = arith.constant 0.000000e+00 : f32
    %98 = vector.shape_cast %95 : vector<1x160xi1> to vector<1x160xi1>
    %99 = vector.broadcast %98 : vector<1x160xi1> to vector<32x160xi1>
    %100 = vector.broadcast %cst_44 : f32 to vector<32x160xf32>
    %101 = arith.select %99, %100, %97 : vector<32x160xi1>, vector<32x160xf32>
    %102 = tpu.concatenate %93, %44, %101 in 0 : vector<32x160xf32>, vector<32x160xf32>, vector<32x160xf32> -> vector<96x160xf32>
    %c2 = arith.constant 2 : index
    %c0_45 = arith.constant 0 : index
    %c0_46 = arith.constant 0 : index
    %103 = vector.load %arg5[%c2, %c0_45, %c0_46] : memref<3x32x96xf32, #tpu.memory_space<vmem>>, vector<1x32x96xf32>
    %104 = vector.shape_cast %103 : vector<1x32x96xf32> to vector<32x96xf32>
    %cst_47 = arith.constant dense<0.000000e+00> : vector<32x160xf32>
    %105 = tpu.matmul %104, %102, %cst_47 {dimension_numbers = #tpu.dot_dimension_numbers<[1], [0], [0], [1], [0, 0, 1, 1], [], []>} : vector<32x96xf32>, vector<96x160xf32>, vector<32x160xf32> -> vector<32x160xf32>
    %106 = arith.addf %85, %105 : vector<32x160xf32>
    %c0_48 = arith.constant 0 : index
    %c0_49 = arith.constant 0 : index
    %c0_50 = arith.constant 0 : index
    %107 = vector.load %arg7[%c0_48, %c0_49, %c0_50] : memref<4x32x1xf32, #tpu.memory_space<vmem>>, vector<1x32x1xf32>
    %108 = vector.shape_cast %107 : vector<1x32x1xf32> to vector<32x1xf32>
    %109 = vector.broadcast %108 : vector<32x1xf32> to vector<32x160xf32>
    %110 = arith.mulf %106, %109 : vector<32x160xf32>
    %c1_51 = arith.constant 1 : index
    %c0_52 = arith.constant 0 : index
    %c0_53 = arith.constant 0 : index
    %111 = vector.load %arg7[%c1_51, %c0_52, %c0_53] : memref<4x32x1xf32, #tpu.memory_space<vmem>>, vector<1x32x1xf32>
    %112 = vector.shape_cast %111 : vector<1x32x1xf32> to vector<32x1xf32>
    %113 = vector.broadcast %112 : vector<32x1xf32> to vector<32x160xf32>
    %114 = arith.addf %110, %113 : vector<32x160xf32>
    %cst_54 = arith.constant 0.000000e+00 : f32
    %115 = vector.broadcast %cst_54 : f32 to vector<32x160xf32>
    %116 = arith.maximumf %114, %115 : vector<32x160xf32>
    %c0_i32_55 = arith.constant 0 : i32
    %117 = arith.cmpi eq, %arg1, %c0_i32_55 : i32
    %118 = vector.extract_strided_slice %116 {offsets = [0, 0], sizes = [32, 16], strides = [1, 1]} : vector<32x160xf32> to vector<32x16xf32>
    %cst_56 = arith.constant 0.000000e+00 : f32
    %119 = vector.broadcast %cst_56 : f32 to vector<32x16xf32>
    %120 = arith.select %117, %119, %118 : vector<32x16xf32>
    %c1_i32_57 = arith.constant 1 : i32
    %121 = arith.cmpi eq, %arg1, %c1_i32_57 : i32
    %122 = vector.extract_strided_slice %116 {offsets = [0, 144], sizes = [32, 16], strides = [1, 1]} : vector<32x160xf32> to vector<32x16xf32>
    %cst_58 = arith.constant 0.000000e+00 : f32
    %123 = vector.broadcast %cst_58 : f32 to vector<32x16xf32>
    %124 = arith.select %121, %123, %122 : vector<32x16xf32>
    %125 = vector.extract_strided_slice %116 {offsets = [0, 16], sizes = [32, 128], strides = [1, 1]} : vector<32x160xf32> to vector<32x128xf32>
    %126 = tpu.iota {dimensions = array<i32: 1>} : vector<1x128xi32>
    %c16_i32_59 = arith.constant 16 : i32
    %c0_i32_60 = arith.constant 0 : i32
    %127 = arith.cmpi eq, %c16_i32_59, %c0_i32_60 : i32
    %c1_i32_61 = arith.constant 1 : i32
    %128 = arith.select %127, %c1_i32_61, %c16_i32_59 : i32
    %129 = vector.broadcast %128 : i32 to vector<1x128xi32>
    %130 = arith.remsi %126, %129 : vector<1x128xi32>
    %c0_i32_62 = arith.constant 0 : i32
    %131 = vector.broadcast %c0_i32_62 : i32 to vector<1x128xi32>
    %132 = arith.cmpi ne, %130, %131 : vector<1x128xi32>
    %c0_i32_63 = arith.constant 0 : i32
    %133 = vector.broadcast %c0_i32_63 : i32 to vector<1x128xi32>
    %134 = arith.cmpi slt, %130, %133 : vector<1x128xi32>
    %c0_i32_64 = arith.constant 0 : i32
    %135 = arith.cmpi slt, %128, %c0_i32_64 : i32
    %136 = vector.broadcast %135 : i1 to vector<1x128xi1>
    %137 = vector.broadcast %136 : vector<1x128xi1> to vector<1x128xi1>
    %138 = arith.xori %134, %137 : vector<1x128xi1>
    %139 = arith.andi %138, %132 : vector<1x128xi1>
    %140 = vector.broadcast %128 : i32 to vector<1x128xi32>
    %141 = arith.addi %130, %140 : vector<1x128xi32>
    %142 = arith.select %139, %141, %130 : vector<1x128xi1>, vector<1x128xi32>
    %cst_65 = arith.constant 0.000000e+00 : f32
    %143 = vector.broadcast %cst_65 : f32 to vector<32x1xf32>
    %144 = vector.extract_strided_slice %125 {offsets = [0, 0], sizes = [32, 112], strides = [1, 1]} : vector<32x128xf32> to vector<32x112xf32>
    %145 = tpu.concatenate %120, %144 in 1 : vector<32x16xf32>, vector<32x112xf32> -> vector<32x128xf32>
    %146 = vector.extract_strided_slice %125 {offsets = [0, 16], sizes = [32, 112], strides = [1, 1]} : vector<32x128xf32> to vector<32x112xf32>
    %147 = tpu.concatenate %146, %124 in 1 : vector<32x112xf32>, vector<32x16xf32> -> vector<32x128xf32>
    %c0_i32_66 = arith.constant 0 : i32
    %148 = vector.broadcast %c0_i32_66 : i32 to vector<1x128xi32>
    %149 = arith.cmpi eq, %142, %148 : vector<1x128xi32>
    %150 = vector.extract_strided_slice %145 {offsets = [0, 0], sizes = [32, 127], strides = [1, 1]} : vector<32x128xf32> to vector<32x127xf32>
    %151 = tpu.concatenate %143, %150 in 1 : vector<32x1xf32>, vector<32x127xf32> -> vector<32x128xf32>
    %cst_67 = arith.constant 0.000000e+00 : f32
    %152 = vector.shape_cast %149 : vector<1x128xi1> to vector<1x128xi1>
    %153 = vector.broadcast %152 : vector<1x128xi1> to vector<32x128xi1>
    %154 = vector.broadcast %cst_67 : f32 to vector<32x128xf32>
    %155 = arith.select %153, %154, %151 : vector<32x128xi1>, vector<32x128xf32>
    %c15_i32_68 = arith.constant 15 : i32
    %156 = vector.broadcast %c15_i32_68 : i32 to vector<1x128xi32>
    %157 = arith.cmpi eq, %142, %156 : vector<1x128xi32>
    %158 = vector.extract_strided_slice %145 {offsets = [0, 1], sizes = [32, 127], strides = [1, 1]} : vector<32x128xf32> to vector<32x127xf32>
    %159 = tpu.concatenate %158, %143 in 1 : vector<32x127xf32>, vector<32x1xf32> -> vector<32x128xf32>
    %cst_69 = arith.constant 0.000000e+00 : f32
    %160 = vector.shape_cast %157 : vector<1x128xi1> to vector<1x128xi1>
    %161 = vector.broadcast %160 : vector<1x128xi1> to vector<32x128xi1>
    %162 = vector.broadcast %cst_69 : f32 to vector<32x128xf32>
    %163 = arith.select %161, %162, %159 : vector<32x128xi1>, vector<32x128xf32>
    %164 = tpu.concatenate %155, %145, %163 in 0 : vector<32x128xf32>, vector<32x128xf32>, vector<32x128xf32> -> vector<96x128xf32>
    %c0_70 = arith.constant 0 : index
    %c0_71 = arith.constant 0 : index
    %c0_72 = arith.constant 0 : index
    %165 = vector.load %arg6[%c0_70, %c0_71, %c0_72] : memref<3x32x96xf32, #tpu.memory_space<vmem>>, vector<1x32x96xf32>
    %166 = vector.shape_cast %165 : vector<1x32x96xf32> to vector<32x96xf32>
    %cst_73 = arith.constant dense<0.000000e+00> : vector<32x128xf32>
    %167 = tpu.matmul %166, %164, %cst_73 {dimension_numbers = #tpu.dot_dimension_numbers<[1], [0], [0], [1], [0, 0, 1, 1], [], []>} : vector<32x96xf32>, vector<96x128xf32>, vector<32x128xf32> -> vector<32x128xf32>
    %c0_i32_74 = arith.constant 0 : i32
    %168 = vector.broadcast %c0_i32_74 : i32 to vector<1x128xi32>
    %169 = arith.cmpi eq, %142, %168 : vector<1x128xi32>
    %170 = vector.extract_strided_slice %125 {offsets = [0, 0], sizes = [32, 127], strides = [1, 1]} : vector<32x128xf32> to vector<32x127xf32>
    %171 = tpu.concatenate %143, %170 in 1 : vector<32x1xf32>, vector<32x127xf32> -> vector<32x128xf32>
    %cst_75 = arith.constant 0.000000e+00 : f32
    %172 = vector.shape_cast %169 : vector<1x128xi1> to vector<1x128xi1>
    %173 = vector.broadcast %172 : vector<1x128xi1> to vector<32x128xi1>
    %174 = vector.broadcast %cst_75 : f32 to vector<32x128xf32>
    %175 = arith.select %173, %174, %171 : vector<32x128xi1>, vector<32x128xf32>
    %c15_i32_76 = arith.constant 15 : i32
    %176 = vector.broadcast %c15_i32_76 : i32 to vector<1x128xi32>
    %177 = arith.cmpi eq, %142, %176 : vector<1x128xi32>
    %178 = vector.extract_strided_slice %125 {offsets = [0, 1], sizes = [32, 127], strides = [1, 1]} : vector<32x128xf32> to vector<32x127xf32>
    %179 = tpu.concatenate %178, %143 in 1 : vector<32x127xf32>, vector<32x1xf32> -> vector<32x128xf32>
    %cst_77 = arith.constant 0.000000e+00 : f32
    %180 = vector.shape_cast %177 : vector<1x128xi1> to vector<1x128xi1>
    %181 = vector.broadcast %180 : vector<1x128xi1> to vector<32x128xi1>
    %182 = vector.broadcast %cst_77 : f32 to vector<32x128xf32>
    %183 = arith.select %181, %182, %179 : vector<32x128xi1>, vector<32x128xf32>
    %184 = tpu.concatenate %175, %125, %183 in 0 : vector<32x128xf32>, vector<32x128xf32>, vector<32x128xf32> -> vector<96x128xf32>
    %c1_78 = arith.constant 1 : index
    %c0_79 = arith.constant 0 : index
    %c0_80 = arith.constant 0 : index
    %185 = vector.load %arg6[%c1_78, %c0_79, %c0_80] : memref<3x32x96xf32, #tpu.memory_space<vmem>>, vector<1x32x96xf32>
    %186 = vector.shape_cast %185 : vector<1x32x96xf32> to vector<32x96xf32>
    %cst_81 = arith.constant dense<0.000000e+00> : vector<32x128xf32>
    %187 = tpu.matmul %186, %184, %cst_81 {dimension_numbers = #tpu.dot_dimension_numbers<[1], [0], [0], [1], [0, 0, 1, 1], [], []>} : vector<32x96xf32>, vector<96x128xf32>, vector<32x128xf32> -> vector<32x128xf32>
    %188 = arith.addf %167, %187 : vector<32x128xf32>
    %c0_i32_82 = arith.constant 0 : i32
    %189 = vector.broadcast %c0_i32_82 : i32 to vector<1x128xi32>
    %190 = arith.cmpi eq, %142, %189 : vector<1x128xi32>
    %191 = vector.extract_strided_slice %147 {offsets = [0, 0], sizes = [32, 127], strides = [1, 1]} : vector<32x128xf32> to vector<32x127xf32>
    %192 = tpu.concatenate %143, %191 in 1 : vector<32x1xf32>, vector<32x127xf32> -> vector<32x128xf32>
    %cst_83 = arith.constant 0.000000e+00 : f32
    %193 = vector.shape_cast %190 : vector<1x128xi1> to vector<1x128xi1>
    %194 = vector.broadcast %193 : vector<1x128xi1> to vector<32x128xi1>
    %195 = vector.broadcast %cst_83 : f32 to vector<32x128xf32>
    %196 = arith.select %194, %195, %192 : vector<32x128xi1>, vector<32x128xf32>
    %c15_i32_84 = arith.constant 15 : i32
    %197 = vector.broadcast %c15_i32_84 : i32 to vector<1x128xi32>
    %198 = arith.cmpi eq, %142, %197 : vector<1x128xi32>
    %199 = vector.extract_strided_slice %147 {offsets = [0, 1], sizes = [32, 127], strides = [1, 1]} : vector<32x128xf32> to vector<32x127xf32>
    %200 = tpu.concatenate %199, %143 in 1 : vector<32x127xf32>, vector<32x1xf32> -> vector<32x128xf32>
    %cst_85 = arith.constant 0.000000e+00 : f32
    %201 = vector.shape_cast %198 : vector<1x128xi1> to vector<1x128xi1>
    %202 = vector.broadcast %201 : vector<1x128xi1> to vector<32x128xi1>
    %203 = vector.broadcast %cst_85 : f32 to vector<32x128xf32>
    %204 = arith.select %202, %203, %200 : vector<32x128xi1>, vector<32x128xf32>
    %205 = tpu.concatenate %196, %147, %204 in 0 : vector<32x128xf32>, vector<32x128xf32>, vector<32x128xf32> -> vector<96x128xf32>
    %c2_86 = arith.constant 2 : index
    %c0_87 = arith.constant 0 : index
    %c0_88 = arith.constant 0 : index
    %206 = vector.load %arg6[%c2_86, %c0_87, %c0_88] : memref<3x32x96xf32, #tpu.memory_space<vmem>>, vector<1x32x96xf32>
    %207 = vector.shape_cast %206 : vector<1x32x96xf32> to vector<32x96xf32>
    %cst_89 = arith.constant dense<0.000000e+00> : vector<32x128xf32>
    %208 = tpu.matmul %207, %205, %cst_89 {dimension_numbers = #tpu.dot_dimension_numbers<[1], [0], [0], [1], [0, 0, 1, 1], [], []>} : vector<32x96xf32>, vector<96x128xf32>, vector<32x128xf32> -> vector<32x128xf32>
    %209 = arith.addf %188, %208 : vector<32x128xf32>
    %c2_90 = arith.constant 2 : index
    %c0_91 = arith.constant 0 : index
    %c0_92 = arith.constant 0 : index
    %210 = vector.load %arg7[%c2_90, %c0_91, %c0_92] : memref<4x32x1xf32, #tpu.memory_space<vmem>>, vector<1x32x1xf32>
    %211 = vector.shape_cast %210 : vector<1x32x1xf32> to vector<32x1xf32>
    %212 = vector.broadcast %211 : vector<32x1xf32> to vector<32x128xf32>
    %213 = arith.mulf %209, %212 : vector<32x128xf32>
    %c3 = arith.constant 3 : index
    %c0_93 = arith.constant 0 : index
    %c0_94 = arith.constant 0 : index
    %214 = vector.load %arg7[%c3, %c0_93, %c0_94] : memref<4x32x1xf32, #tpu.memory_space<vmem>>, vector<1x32x1xf32>
    %215 = vector.shape_cast %214 : vector<1x32x1xf32> to vector<32x1xf32>
    %216 = vector.broadcast %215 : vector<32x1xf32> to vector<32x128xf32>
    %217 = arith.addf %213, %216 : vector<32x128xf32>
    %218 = arith.addf %217, %1 : vector<32x128xf32>
    %cst_95 = arith.constant 0.000000e+00 : f32
    %219 = vector.broadcast %cst_95 : f32 to vector<32x128xf32>
    %220 = arith.maximumf %218, %219 : vector<32x128xf32>
    %c0_96 = arith.constant 0 : index
    %c0_97 = arith.constant 0 : index
    %c0_98 = arith.constant 0 : index
    %221 = vector.load %arg8[%c0_96, %c0_97, %c0_98] : memref<1x32x128xf32, #tpu.memory_space<vmem>>, vector<1x32x128xf32>
    %222 = vector.shape_cast %221 : vector<1x32x128xf32> to vector<32x128xf32>
    %223 = vector.shape_cast %220 : vector<32x128xf32> to vector<1x32x128xf32>
    tpu.vector_store %arg8[%c0_96, %c0_97, %c0_98], %223 {strides = array<i32>} : memref<1x32x128xf32, #tpu.memory_space<vmem>>, vector<1x32x128xf32>,
    return
  }
  func.func @transform_0(%arg0: i32, %arg1: i32) -> (i32, i32, i32) {
    %c0_i32 = arith.constant 0 : i32
    %c0_i32_0 = arith.constant 0 : i32
    return %arg0, %c0_i32, %arg1 : i32, i32, i32
  }
  func.func @transform_1(%arg0: i32, %arg1: i32) -> (i32, i32, i32, i32) {
    %c1_i32 = arith.constant 1 : i32
    %0 = arith.muli %arg1, %c1_i32 : i32
    %c1_i32_0 = arith.constant 1 : i32
    %1 = arith.subi %0, %c1_i32_0 : i32
    %c0_i32 = arith.constant 0 : i32
    %2 = arith.maxsi %1, %c0_i32 : i32
    %c0_i32_1 = arith.constant 0 : i32
    %c0_i32_2 = arith.constant 0 : i32
    %c0_i32_3 = arith.constant 0 : i32
    return %arg0, %c0_i32_1, %2, %c0_i32_2 : i32, i32, i32, i32
  }
  func.func @transform_2(%arg0: i32, %arg1: i32) -> (i32, i32, i32, i32) {
    %c1_i32 = arith.constant 1 : i32
    %0 = arith.addi %arg1, %c1_i32 : i32
    %c1_i32_0 = arith.constant 1 : i32
    %1 = arith.muli %0, %c1_i32_0 : i32
    %c1_i32_1 = arith.constant 1 : i32
    %2 = arith.minsi %1, %c1_i32_1 : i32
    %c0_i32 = arith.constant 0 : i32
    %c0_i32_2 = arith.constant 0 : i32
    %c0_i32_3 = arith.constant 0 : i32
    return %arg0, %c0_i32, %2, %c0_i32_2 : i32, i32, i32, i32
  }
  func.func @transform_3(%arg0: i32, %arg1: i32) -> (i32, i32, i32) {
    %c0_i32 = arith.constant 0 : i32
    %c0_i32_0 = arith.constant 0 : i32
    %c0_i32_1 = arith.constant 0 : i32
    %c0_i32_2 = arith.constant 0 : i32
    return %c0_i32, %c0_i32_0, %c0_i32_1 : i32, i32, i32
  }
  func.func @transform_4(%arg0: i32, %arg1: i32) -> (i32, i32, i32) {
    %c0_i32 = arith.constant 0 : i32
    %c0_i32_0 = arith.constant 0 : i32
    %c0_i32_1 = arith.constant 0 : i32
    %c0_i32_2 = arith.constant 0 : i32
    return %c0_i32, %c0_i32_0, %c0_i32_1 : i32, i32, i32
  }
  func.func @transform_5(%arg0: i32, %arg1: i32) -> (i32, i32, i32) {
    %c0_i32 = arith.constant 0 : i32
    %c0_i32_0 = arith.constant 0 : i32
    %c0_i32_1 = arith.constant 0 : i32
    %c0_i32_2 = arith.constant 0 : i32
    return %c0_i32, %c0_i32_0, %c0_i32_1 : i32, i32, i32
  }
  func.func @transform_6(%arg0: i32, %arg1: i32) -> (i32, i32, i32) {
    %c0_i32 = arith.constant 0 : i32
    %c0_i32_0 = arith.constant 0 : i32
    return %arg0, %c0_i32, %arg1 : i32, i32, i32
  }
}

</mosaic_0001>

<bundles_post_ra>
// kernel: basic_block_forward.1
= control target key start
LH: loop header
LB: loop body
LE: loop exit
PB: predicated region body
PF: predicated region fallthrough
CT: control target
= control target key end

     0   :  { %s5278_s0 = inlined_call_operand.vmem [shape: f32[2,32,256], index: 0, kind: input, shape index: {}]   ;;  %s5279_s1 = inlined_call_operand.vmem [shape: f32[2,32,16,16], index: 1, kind: input, shape index: {}, may-alias: {1,2}]   ;;  %s5280_s2 = inlined_call_operand.vmem [shape: f32[2,32,16,16], index: 2, kind: input, shape index: {}, may-alias: {1,2}]   ;;  %s5281_s3 = inlined_call_operand.vmem [shape: f32[3,32,96], index: 3, kind: input, shape index: {}]   ;;  %s5282_s4 = inlined_call_operand.vmem [shape: f32[3,32,96], index: 4, kind: input, shape index: {}]   ;;  %s5283_s5 = inlined_call_operand.vmem [shape: f32[4,32,1], index: 5, kind: input, shape index: {}]   ;;  %s5284_s6 = inlined_call_operand.vmem [shape: f32[2,32,256], index: 6, kind: output, shape index: {}]  }
   0x1   :  { %5287 = sst [smem:[#allocation10_spill]] %s5284_s6 }
   0x2   :  { %s3539_s21 = smov 0   ;;  %s3541_s22 = smov 0  }
   0x3   :  { %s3543_s23 = smov 0   ;;  %s3545_s24 = smov 0  }
   0x4   :  { %s3547_s25 = smov 0   ;;  %s3549_s26 = smov 0  }
   0x5   :  { %s3551_s27 = smov 0   ;;  %s3553_s28 = smov 0  }
   0x6   :  { %s3555_s29 = smov 0   ;;  %s3557_s30 = smov 0  }
   0x7   :  { %s3559_s7 = smov 0  }
   0x8 LB: > { %s2936_s8 = sadd.s32 4294967295, %s3493_s7   ;;  %s25_s9 = sadd.s32 1, %s3485_s29  ;;  %s3493_s7 = sphi %s3559_s7, %s16_s7   ;;  %s3489_s30 = sphi %s3557_s30, %s5322_s30   ;;  %s3485_s29 = sphi %s3555_s29, %s5321_s29   ;;  %s3481_s28 = sphi %s3553_s28, %s5320_s28   ;;  %s3477_s27 = sphi %s3551_s27, %s5319_s27   ;;  %s3473_s26 = sphi %s3549_s26, %s5318_s26   ;;  %s3469_s25 = sphi %s3547_s25, %s5317_s25   ;;  %s3465_s24 = sphi %s3545_s24, %s5316_s24   ;;  %s3461_s23 = sphi %s3543_s23, %s5315_s23   ;;  %s3457_s22 = sphi %s3541_s22, %s5314_s22   ;;  %s3453_s21 = sphi %s3539_s21, %s5313_s21  }
   0x9   : > { %p26_p0 = scmp.ge.s32.totalorder %s25_s9, 2  ;;  %s28_s10 = sadd.s32 1, %s3489_s30 }
   0xa   : > { %s37_s11 = sadd.s32 1, %s3473_s26  ;;  %p44_p1 = scmp.ne.s32.totalorder %s3473_s26, %s3469_s25 }
   0xb   : > { %s5324_s9 = smov (%p26_p0, %s25_s9), 0  ;;  %s5326_s10 = smov (!%p26_p0, %s28_s10), %s3489_s30 }
   0xc   : > { %5288 = sst [smem:[#allocation6_spill]] %s5324_s9  ;;  %s33_s12 = ssub.s32 %s3485_s29, %s5324_s9 }
   0xd   : > { %p45_p2 = scmp.eq.s32.totalorder %s3493_s7, 0  ;;  %p30_p3 = scmp.ge.s32.totalorder %s5326_s10, 2 }
   0xe   : > { %s71_s16 = sadd.s32 1, %s3465_s24  ;;  %p78_p6 = scmp.ne.s32.totalorder %s3465_s24, %s3461_s23 }
   0xf   : > { %p3611_p4 = por %p45_p2, %p44_p1  ;;  %s5328_s10 = smov (%p30_p3, %s5326_s10), 0 }
  0x10   : > { %5290 = sst [smem:[#allocation7_spill]] %s5328_s10  ;;  %s32_s14 = ssub.s32 %s3489_s30, %s5328_s10 }
  0x11   : > { %s34_s15 = sor.u32 %s33_s12, %s32_s14  ;;  %p69_p7 = scmp.eq.s32.totalorder %s32_s14, 0 }
  0x12   : > { %p35_p5 = scmp.eq.s32.totalorder %s34_s15, 0  ;;  %p3627_p8 = por %p78_p6, %p45_p2 }
  0x13   : > { %s3632_s19 = scalar_select %p69_p7, %s3465_s24, %s71_s16  }
  0x14   : > { %s3621_s17 = scalar_select %p35_p5, %s3473_s26, %s37_s11  }
  0x15   : > { %5293 = sst [smem:[#allocation9_spill]] %s3632_s19  ;;  %p112_p9 = scmp.ne.s32.totalorder %s3457_s22, %s3453_s21 }
  0x16   : > { %5291 = sst [smem:[#allocation8_spill]] %s3621_s17  ;;  %p207_p10 = scmp.eq.s32.totalorder %s2936_s8, 3 }
  0x17   : > { %p3638_p11 = por %p112_p9, %p45_p2  ;;  %s105_s12 = sadd.s32 1, %s3457_s22 }
  0x18   : > { %p3645_p12 = por %p207_p10, %p44_p1  ;;  %p2941_p13 = scmp.ge.s32.totalorder %s3493_s7, 4 }
  0x19   : > { %s3651_s14 = scalar_select %p69_p7, %s3457_s22, %s105_s12  }
  0x1a   : > { %238 = sbr.rel (%p2941_p13) target bundleno = 80 (0x50), region = 28 }
  0x1f   : > { %241 = sbr.rel (!%p3611_p4) target bundleno = 39 (0x27), region = 32  ;;  %s243_s8 = sand.u32 (%p3611_p4), 1, %s3473_s26  }
  0x20   : > { %s2943_s15 = sshll.u32 (%p3611_p4), %s3489_s30, 3  ;;  %s2942_s16 = sshll.u32 (%p3611_p4), %s243_s8, 5 }
  0x21   : > { %s247_s10 = sadd.s32 (%p3611_p4), %s3485_s29, %s2943_s15  ;;  %s245_s12 = scalar_lea.vmem (%p3611_p4), [#allocation2], %s2942_s16 }
  0x22   : > { %s2944_s9 = sshll.u32 (%p3611_p4), %s247_s10, 3 }
  0x23   : > { %s249_s6 = scalar_lea.vmem (%p3611_p4), %s5278_s0, %s2944_s9 }
  0x24   : > { %v284_v0 = vld [vmem:[%s249_s6] sm:$0xff]  ;;  %v286_v1 = vld [vmem:[%s249_s6 + $0x10] sm:$0xff] }
  0x25   : > { %v288_v2 = vld [vmem:[%s249_s6 + $0x20] sm:$0xff]  ;;  %285 = vst [vmem:[%s245_s12] sm:$0xff] %v284_v0  ;;  %287 = vst [vmem:[%s245_s12 + $0x8] sm:$0xff] %v286_v1  ;;  %v290_v3 = vld [vmem:[%s249_s6 + $0x30] sm:$0xff] }
  0x26   : > { %289 = vst [vmem:[%s245_s12 + $0x10] sm:$0xff] %v288_v2  ;;  %291 = vst [vmem:[%s245_s12 + $0x18] sm:$0xff] %v290_v3 }
  0x27 PF: > { %297 = sbr.rel (!%p3627_p8) target bundleno = 59 (0x3b), region = 70  ;;  %s299_s10 = sand.u32 (%p3627_p8), 1, %s3465_s24  }
  0x28   : > { %s2945_s13 = sshll.u32 (%p3627_p8), %s299_s10, 8  ;;  %s3447_s8 = sshll.u32 (%p3627_p8), %s3489_s30, 9 }
  0x29   : > { %s3669_s19 = scalar_lea.vmem (%p3627_p8), %s5279_s1, %s3447_s8  ;;  %s3674_s6 = scalar_lea.vmem (%p3627_p8), [#allocation3], %s2945_s13 }
  0x2a   : > { %v399_v4 = vld [vmem:[%s3669_s19] sm:$0xff] (%p3627_p8)  ;;  %v401_v5 = vld [vmem:[%s3669_s19 + $0x10] sm:$0xff] (%p3627_p8) }
  0x2b   : > { %v403_v6 = vld [vmem:[%s3669_s19 + $0x20] sm:$0xff] (%p3627_p8)  ;;  %400 = vst [vmem:[%s3674_s6] sm:$0xff] (%p3627_p8), %v399_v4  ;;  %402 = vst [vmem:[%s3674_s6 + $0x8] sm:$0xff] (%p3627_p8), %v401_v5  ;;  %v405_v7 = vld [vmem:[%s3669_s19 + $0x30] sm:$0xff] (%p3627_p8) }
  0x2c   : > { %404 = vst [vmem:[%s3674_s6 + $0x10] sm:$0xff] %v403_v6  ;;  %v407_v8 = vld [vmem:[%s3669_s19 + $0x40] sm:$0xff]  ;;  %v409_v9 = vld [vmem:[%s3669_s19 + $0x50] sm:$0xff]  ;;  %406 = vst [vmem:[%s3674_s6 + $0x18] sm:$0xff] %v405_v7 }
  0x2d   : > { %408 = vst [vmem:[%s3674_s6 + $0x20] sm:$0xff] %v407_v8  ;;  %410 = vst [vmem:[%s3674_s6 + $0x28] sm:$0xff] %v409_v9  ;;  %v411_v10 = vld [vmem:[%s3669_s19 + $0x60] sm:$0xff]  ;;  %v413_v11 = vld [vmem:[%s3669_s19 + $0x70] sm:$0xff] }
  0x2e   : > { %v415_v12 = vld [vmem:[%s3669_s19 + $0x80] sm:$0xff]  ;;  %412 = vst [vmem:[%s3674_s6 + $0x30] sm:$0xff] %v411_v10  ;;  %414 = vst [vmem:[%s3674_s6 + $0x38] sm:$0xff] %v413_v11  ;;  %v417_v13 = vld [vmem:[%s3669_s19 + $0x90] sm:$0xff] }
  0x2f   : > { %416 = vst [vmem:[%s3674_s6 + $0x40] sm:$0xff] %v415_v12  ;;  %v419_v14 = vld [vmem:[%s3669_s19 + $0xa0] sm:$0xff]  ;;  %v421_v15 = vld [vmem:[%s3669_s19 + $0xb0] sm:$0xff]  ;;  %418 = vst [vmem:[%s3674_s6 + $0x48] sm:$0xff] %v417_v13 }
  0x30   : > { %420 = vst [vmem:[%s3674_s6 + $0x50] sm:$0xff] %v419_v14  ;;  %422 = vst [vmem:[%s3674_s6 + $0x58] sm:$0xff] %v421_v15  ;;  %v423_v16 = vld [vmem:[%s3669_s19 + $0xc0] sm:$0xff]  ;;  %v425_v17 = vld [vmem:[%s3669_s19 + $0xd0] sm:$0xff] }
  0x31   : > { %v427_v18 = vld [vmem:[%s3669_s19 + $0xe0] sm:$0xff]  ;;  %424 = vst [vmem:[%s3674_s6 + $0x60] sm:$0xff] %v423_v16  ;;  %426 = vst [vmem:[%s3674_s6 + $0x68] sm:$0xff] %v425_v17  ;;  %v429_v19 = vld [vmem:[%s3669_s19 + $0xf0] sm:$0xff] }
  0x32   : > { %428 = vst [vmem:[%s3674_s6 + $0x70] sm:$0xff] %v427_v18  ;;  %v431_v20 = vld [vmem:[%s3669_s19 + $0x100] sm:$0xff]  ;;  %v433_v21 = vld [vmem:[%s3669_s19 + $0x110] sm:$0xff]  ;;  %430 = vst [vmem:[%s3674_s6 + $0x78] sm:$0xff] %v429_v19 }
  0x33   : > { %432 = vst [vmem:[%s3674_s6 + $0x80] sm:$0xff] %v431_v20  ;;  %434 = vst [vmem:[%s3674_s6 + $0x88] sm:$0xff] %v433_v21  ;;  %v435_v22 = vld [vmem:[%s3669_s19 + $0x120] sm:$0xff]  ;;  %v437_v23 = vld [vmem:[%s3669_s19 + $0x130] sm:$0xff] }
  0x34   : > { %v439_v24 = vld [vmem:[%s3669_s19 + $0x140] sm:$0xff]  ;;  %436 = vst [vmem:[%s3674_s6 + $0x90] sm:$0xff] %v435_v22  ;;  %438 = vst [vmem:[%s3674_s6 + $0x98] sm:$0xff] %v437_v23  ;;  %v441_v25 = vld [vmem:[%s3669_s19 + $0x150] sm:$0xff] }
  0x35   : > { %440 = vst [vmem:[%s3674_s6 + $0xa0] sm:$0xff] %v439_v24  ;;  %v443_v26 = vld [vmem:[%s3669_s19 + $0x160] sm:$0xff]  ;;  %v445_v27 = vld [vmem:[%s3669_s19 + $0x170] sm:$0xff]  ;;  %442 = vst [vmem:[%s3674_s6 + $0xa8] sm:$0xff] %v441_v25 }
  0x36   : > { %444 = vst [vmem:[%s3674_s6 + $0xb0] sm:$0xff] %v443_v26  ;;  %446 = vst [vmem:[%s3674_s6 + $0xb8] sm:$0xff] %v445_v27  ;;  %v447_v28 = vld [vmem:[%s3669_s19 + $0x180] sm:$0xff]  ;;  %v449_v29 = vld [vmem:[%s3669_s19 + $0x190] sm:$0xff] }
  0x37   : > { %v451_v30 = vld [vmem:[%s3669_s19 + $0x1a0] sm:$0xff]  ;;  %448 = vst [vmem:[%s3674_s6 + $0xc0] sm:$0xff] %v447_v28  ;;  %450 = vst [vmem:[%s3674_s6 + $0xc8] sm:$0xff] %v449_v29  ;;  %v453_v31 = vld [vmem:[%s3669_s19 + $0x1b0] sm:$0xff] }
  0x38   : > { %452 = vst [vmem:[%s3674_s6 + $0xd0] sm:$0xff] %v451_v30  ;;  %v455_v32 = vld [vmem:[%s3669_s19 + $0x1c0] sm:$0xff]  ;;  %v457_v33 = vld [vmem:[%s3669_s19 + $0x1d0] sm:$0xff]  ;;  %454 = vst [vmem:[%s3674_s6 + $0xd8] sm:$0xff] %v453_v31 }
  0x39   : > { %456 = vst [vmem:[%s3674_s6 + $0xe0] sm:$0xff] %v455_v32  ;;  %458 = vst [vmem:[%s3674_s6 + $0xe8] sm:$0xff] %v457_v33  ;;  %v459_v34 = vld [vmem:[%s3669_s19 + $0x1e0] sm:$0xff]  ;;  %v461_v35 = vld [vmem:[%s3669_s19 + $0x1f0] sm:$0xff] }
  0x3a   : > { %460 = vst [vmem:[%s3674_s6 + $0xf0] sm:$0xff] %v459_v34  ;;  %462 = vst [vmem:[%s3674_s6 + $0xf8] sm:$0xff] %v461_v35 }
  0x3b PF: > { %468 = sbr.rel (!%p3638_p11) target bundleno = 80 (0x50), region = 108  ;;  %s470_s18 = sand.u32 (%p3638_p11), 1, %s3457_s22  }
  0x3c   : > { %s2949_s15 = sshll.u32 (%p3638_p11), %s470_s18, 8  ;;  %s3450_s16 = sshll.u32 (%p3638_p11), %s3489_s30, 9 }
  0x3d   : > { %s3449_s12 = sadd.s32 (%p3638_p11), 8, %s3450_s16  ;;  %s3749_s20 = scalar_lea.vmem (%p3638_p11), [#allocation4], %s2949_s15 }
  0x3e   : > { %s3744_s8 = scalar_lea.vmem (%p3638_p11), %s5280_s2, %s3449_s12 }
  0x3f   : > { %v570_v36 = vld [vmem:[%s3744_s8] sm:$0xff] (%p3638_p11)  ;;  %v572_v37 = vld [vmem:[%s3744_s8 + $0x10] sm:$0xff] (%p3638_p11) }
  0x40   : > { %v574_v38 = vld [vmem:[%s3744_s8 + $0x20] sm:$0xff]  ;;  %571 = vst [vmem:[%s3749_s20] sm:$0xff] %v570_v36  ;;  %573 = vst [vmem:[%s3749_s20 + $0x8] sm:$0xff] %v572_v37  ;;  %v576_v39 = vld [vmem:[%s3744_s8 + $0x30] sm:$0xff] }
  0x41   : > { %575 = vst [vmem:[%s3749_s20 + $0x10] sm:$0xff] %v574_v38  ;;  %v578_v40 = vld [vmem:[%s3744_s8 + $0x40] sm:$0xff]  ;;  %v580_v41 = vld [vmem:[%s3744_s8 + $0x50] sm:$0xff]  ;;  %577 = vst [vmem:[%s3749_s20 + $0x18] sm:$0xff] %v576_v39 }
  0x42   : > { %579 = vst [vmem:[%s3749_s20 + $0x20] sm:$0xff] %v578_v40  ;;  %581 = vst [vmem:[%s3749_s20 + $0x28] sm:$0xff] %v580_v41  ;;  %v582_v42 = vld [vmem:[%s3744_s8 + $0x60] sm:$0xff]  ;;  %v584_v43 = vld [vmem:[%s3744_s8 + $0x70] sm:$0xff] }
  0x43   : > { %v586_v44 = vld [vmem:[%s3744_s8 + $0x80] sm:$0xff]  ;;  %583 = vst [vmem:[%s3749_s20 + $0x30] sm:$0xff] %v582_v42  ;;  %585 = vst [vmem:[%s3749_s20 + $0x38] sm:$0xff] %v584_v43  ;;  %v588_v45 = vld [vmem:[%s3744_s8 + $0x90] sm:$0xff] }
  0x44   : > { %587 = vst [vmem:[%s3749_s20 + $0x40] sm:$0xff] %v586_v44  ;;  %v590_v46 = vld [vmem:[%s3744_s8 + $0xa0] sm:$0xff]  ;;  %v592_v47 = vld [vmem:[%s3744_s8 + $0xb0] sm:$0xff]  ;;  %589 = vst [vmem:[%s3749_s20 + $0x48] sm:$0xff] %v588_v45 }
  0x45   : > { %591 = vst [vmem:[%s3749_s20 + $0x50] sm:$0xff] %v590_v46  ;;  %593 = vst [vmem:[%s3749_s20 + $0x58] sm:$0xff] %v592_v47  ;;  %v594_v48 = vld [vmem:[%s3744_s8 + $0xc0] sm:$0xff]  ;;  %v596_v49 = vld [vmem:[%s3744_s8 + $0xd0] sm:$0xff] }
  0x46   : > { %v598_v50 = vld [vmem:[%s3744_s8 + $0xe0] sm:$0xff]  ;;  %595 = vst [vmem:[%s3749_s20 + $0x60] sm:$0xff] %v594_v48  ;;  %597 = vst [vmem:[%s3749_s20 + $0x68] sm:$0xff] %v596_v49  ;;  %v600_v51 = vld [vmem:[%s3744_s8 + $0xf0] sm:$0xff] }
  0x47   : > { %599 = vst [vmem:[%s3749_s20 + $0x70] sm:$0xff] %v598_v50  ;;  %v602_v52 = vld [vmem:[%s3744_s8 + $0x100] sm:$0xff]  ;;  %v604_v53 = vld [vmem:[%s3744_s8 + $0x110] sm:$0xff]  ;;  %601 = vst [vmem:[%s3749_s20 + $0x78] sm:$0xff] %v600_v51 }
  0x48   : > { %603 = vst [vmem:[%s3749_s20 + $0x80] sm:$0xff] %v602_v52  ;;  %605 = vst [vmem:[%s3749_s20 + $0x88] sm:$0xff] %v604_v53  ;;  %v606_v54 = vld [vmem:[%s3744_s8 + $0x120] sm:$0xff]  ;;  %v608_v55 = vld [vmem:[%s3744_s8 + $0x130] sm:$0xff] }
  0x49   : > { %v610_v56 = vld [vmem:[%s3744_s8 + $0x140] sm:$0xff]  ;;  %607 = vst [vmem:[%s3749_s20 + $0x90] sm:$0xff] %v606_v54  ;;  %609 = vst [vmem:[%s3749_s20 + $0x98] sm:$0xff] %v608_v55  ;;  %v612_v57 = vld [vmem:[%s3744_s8 + $0x150] sm:$0xff] }
  0x4a   : > { %611 = vst [vmem:[%s3749_s20 + $0xa0] sm:$0xff] %v610_v56  ;;  %v614_v58 = vld [vmem:[%s3744_s8 + $0x160] sm:$0xff]  ;;  %v616_v59 = vld [vmem:[%s3744_s8 + $0x170] sm:$0xff]  ;;  %613 = vst [vmem:[%s3749_s20 + $0xa8] sm:$0xff] %v612_v57 }
  0x4b   : > { %615 = vst [vmem:[%s3749_s20 + $0xb0] sm:$0xff] %v614_v58  ;;  %617 = vst [vmem:[%s3749_s20 + $0xb8] sm:$0xff] %v616_v59  ;;  %v618_v60 = vld [vmem:[%s3744_s8 + $0x180] sm:$0xff]  ;;  %v620_v61 = vld [vmem:[%s3744_s8 + $0x190] sm:$0xff] }
  0x4c   : > { %v622_v62 = vld [vmem:[%s3744_s8 + $0x1a0] sm:$0xff]  ;;  %619 = vst [vmem:[%s3749_s20 + $0xc0] sm:$0xff] %v618_v60  ;;  %621 = vst [vmem:[%s3749_s20 + $0xc8] sm:$0xff] %v620_v61  ;;  %v624_v63 = vld [vmem:[%s3744_s8 + $0x1b0] sm:$0xff] }
  0x4d   : > { %623 = vst [vmem:[%s3749_s20 + $0xd0] sm:$0xff] %v622_v62  ;;  %v626_v0 = vld [vmem:[%s3744_s8 + $0x1c0] sm:$0xff]  ;;  %v628_v1 = vld [vmem:[%s3744_s8 + $0x1d0] sm:$0xff]  ;;  %625 = vst [vmem:[%s3749_s20 + $0xd8] sm:$0xff] %v624_v63 }
  0x4e   : > { %627 = vst [vmem:[%s3749_s20 + $0xe0] sm:$0xff] %v626_v0  ;;  %629 = vst [vmem:[%s3749_s20 + $0xe8] sm:$0xff] %v628_v1  ;;  %v630_v2 = vld [vmem:[%s3744_s8 + $0x1e0] sm:$0xff]  ;;  %v632_v3 = vld [vmem:[%s3744_s8 + $0x1f0] sm:$0xff] }
  0x4f   : > { %631 = vst [vmem:[%s3749_s20 + $0xf0] sm:$0xff] %v630_v2  ;;  %633 = vst [vmem:[%s3749_s20 + $0xf8] sm:$0xff] %v632_v3 }
  0x50 PF: > { %p2952_p0 = scmp.ge.s32.totalorder %s3493_s7, 1  ;;  %p638_p1 = scmp.lt.s32.totalorder %s3493_s7, 5 }
  0x52   : > { %p639_p2 = pnand %p2952_p0, %p638_p1 }
  0x53   : > { %s645_s17 = sand.u32 (!%p639_p2), 1, %s3469_s25   ;;  %s659_s19 = sand.u32 (!%p639_p2), 1, %s3453_s21  }
  0x54   : > { %642 = sbr.rel (%p639_p2) target bundleno = 1246 (0x4de), region = 146  ;;  %s3815_s9 = sshll.u32 (!%p639_p2), %s645_s17, 5 }
  0x55   : > { %s3819_s6 = scalar_lea.vmem (!%p639_p2), [#allocation2], %s3815_s9  ;;  %s2955_s18 = sshll.u32 (!%p639_p2), %s659_s19, 8 }
  0x56   : > { %p837_p3 = scmp.eq.s32.totalorder (!%p639_p2), %s3477_s27, 1  ;;  %s3495_s15 = smov (!%p639_p2), 16  }
  0x57   : > { %s3826_s16 = scalar_lea.vmem (!%p639_p2), [#allocation4], %s2955_s18  ;;  %p705_p4 = scmp.eq.s32.totalorder (!%p639_p2), %s3477_s27, 0 }
  0x58   : > { %s652_s25 = sand.u32 (!%p639_p2), 1, %s3461_s23   ;;  %s3496_s23 = smov (!%p639_p2), 112  }
  0x59   : > { %v704_v4 = vld [vmem:[%s3819_s6 + $0x18] sm:$0xff]  ;;  %v703_v5 = vld [vmem:[%s3819_s6 + $0x10] sm:$0xff]  ;;  %v862_v6 = vld [vmem:[%s3826_s16 + $0xc0] sm:$0x1]  ;;  %vm1002_vm0 = vcmask 1041409   ;;  %vm1005_vm1 = vcmask 1042434  }
  0x5a   : > { %1078 = vrot.lane.b32.xlu0 %v704_v4, %s3495_s15  ;;  %1076 = vrot.lane.b32.xlu1 %v703_v5, %s3495_s15  ;;  %vm1008_vm2 = vcmask 1043459   ;;  %v863_v7 = vld [vmem:[%s3826_s16 + $0xc8] sm:$0x1]  ;;  %v864_v8 = vld [vmem:[%s3826_s16 + $0xd0] sm:$0x1]  ;;  %vm1011_vm3 = vcmask 1044484  }
  0x5b   : > { %s870_s21 = scalar_select %p837_p3, 1, 0  ;;  %v865_v9 = vld [vmem:[%s3826_s16 + $0xd8] sm:$0x1]  ;;  %v866_v10 = vld [vmem:[%s3826_s16 + $0xe0] sm:$0x1] }
  0x5c   : > { %v867_v11 = vld [vmem:[%s3826_s16 + $0xe8] sm:$0x1]  ;;  %vm1014_vm4 = vcmask 1045509   ;;  %v868_v12 = vld [vmem:[%s3826_s16 + $0xf0] sm:$0x1]  ;;  %vm1017_vm5 = vcmask 1046534  }
  0x5d   : > { %v869_v13 = vld [vmem:[%s3826_s16 + $0xf8] sm:$0x1]  ;;  %v871_v14 = vstv %s870_s21  ;;  %v854_v15 = vld [vmem:[%s3826_s16 + $0x80] sm:$0x1]  ;;  %vm1020_vm7 = vcmask 1047559   ;;  %s2954_s10 = sshll.u32 %s652_s25, 8 }
  0x5e   : > { %vm3837_vm6 = vcmp.eq.s32.totalorder %v871_v14, 1  ;;  %v855_v17 = vld [vmem:[%s3826_s16 + $0x88] sm:$0x1]  ;;  %v856_v18 = vld [vmem:[%s3826_s16 + $0x90] sm:$0x1]  ;;  %s4098_s13 = scalar_lea.vmem [#allocation3], %s2954_s10 }
  0x5f   : > { %v857_v19 = vld [vmem:[%s3826_s16 + $0x98] sm:$0x1]  ;;  %v897_v20 = vsel %vm3837_vm6, 0.0, %v862_v6  ;;  %v898_v21 = vsel %vm3837_vm6, 0.0, %v863_v7  ;;  %v899_v22 = vsel %vm3837_vm6, 0.0, %v864_v8  ;;  %v900_v23 = vsel %vm3837_vm6, 0.0, %v865_v9 }
  0x60   : > { %v858_v24 = vld [vmem:[%s3826_s16 + $0xa0] sm:$0x1]  ;;  %v901_v25 = vsel %vm3837_vm6, 0.0, %v866_v10  ;;  %v902_v26 = vsel %vm3837_vm6, 0.0, %v867_v11  ;;  %v903_v27 = vsel %vm3837_vm6, 0.0, %v868_v12  ;;  %v904_v28 = vsel %vm3837_vm6, 0.0, %v869_v13 }
  0x61   : > { %v859_v29 = vld [vmem:[%s3826_s16 + $0xa8] sm:$0x1]  ;;  %v1158_v30 = vrot.slane %v898_v21, 7  ;;  %v1160_v31 = vrot.slane %v899_v22, 6  ;;  %v1162_v32 = vrot.slane %v900_v23, 5  ;;  %v1164_v33 = vrot.slane %v901_v25, 4 }
  0x62   : > { %v860_v34 = vld [vmem:[%s3826_s16 + $0xb0] sm:$0x1]  ;;  %v1166_v35 = vrot.slane %v902_v26, 3  ;;  %v1168_v36 = vrot.slane %v903_v27, 2  ;;  %v1170_v37 = vrot.slane %v904_v28, 1  ;;  %v889_v39 = vsel %vm3837_vm6, 0.0, %v854_v15 }
  0x63   : > { %v861_v38 = vld [vmem:[%s3826_s16 + $0xb8] sm:$0x1]  ;;  %v1159_v40 = vsel %vm1002_vm0, %v1158_v30, %v897_v20  ;;  %v890_v41 = vsel %vm3837_vm6, 0.0, %v855_v17  ;;  %v891_v42 = vsel %vm3837_vm6, 0.0, %v856_v18  ;;  %v892_v43 = vsel %vm3837_vm6, 0.0, %v857_v19  ;;  %v702_v25 = vld [vmem:[%s3819_s6 + $0x8] sm:$0xff] }
  0x64   : > { %v846_v44 = vld [vmem:[%s3826_s16 + $0x40] sm:$0x1]  ;;  %v847_v45 = vld [vmem:[%s3826_s16 + $0x48] sm:$0x1]  ;;  %v1161_v46 = vsel %vm1005_vm1, %v1160_v31, %v1159_v40  ;;  %v893_v47 = vsel %vm3837_vm6, 0.0, %v858_v24  ;;  %v894_v48 = vsel %vm3837_vm6, 0.0, %v859_v29 }
  0x65   : > { %v895_v49 = vsel %vm3837_vm6, 0.0, %v860_v34  ;;  %v848_v50 = vld [vmem:[%s3826_s16 + $0x50] sm:$0x1]  ;;  %v1163_v51 = vsel %vm1008_vm2, %v1162_v32, %v1161_v46  ;;  %v896_v52 = vsel %vm3837_vm6, 0.0, %v861_v38  ;;  %v1144_v53 = vrot.slane %v890_v41, 7  ;;  %s3497_s8 = smov 127  }
  0x66   : > { %v1146_v54 = vrot.slane %v891_v42, 6  ;;  %v849_v55 = vld [vmem:[%s3826_s16 + $0x58] sm:$0x1]  ;;  %v1165_v56 = vsel %vm1011_vm3, %v1164_v33, %v1163_v51  ;;  %v1148_v57 = vrot.slane %v892_v43, 5  ;;  %v1150_v58 = vrot.slane %v893_v47, 4  ;;  %s3498_s20 = smov 1  }
  0x67   : > { %v1152_v59 = vrot.slane %v894_v48, 3  ;;  %v850_v60 = vld [vmem:[%s3826_s16 + $0x60] sm:$0x1]  ;;  %v1167_v61 = vsel %vm1014_vm4, %v1166_v35, %v1165_v56  ;;  %v1145_v62 = vsel %vm1002_vm0, %v1144_v53, %v889_v39  ;;  %v1154_v63 = vrot.slane %v895_v49, 2  ;;  %v851_v1 = vld [vmem:[%s3826_s16 + $0x68] sm:$0x1] }
  0x68   : > { %v1156_v0 = vrot.slane %v896_v52, 1  ;;  %v852_v2 = vld [vmem:[%s3826_s16 + $0x70] sm:$0x1]  ;;  %v1169_v3 = vsel %vm1017_vm5, %v1168_v36, %v1167_v61  ;;  %v1147_v4 = vsel %vm1005_vm1, %v1146_v54, %v1145_v62  ;;  %v853_v5 = vld [vmem:[%s3826_s16 + $0x78] sm:$0x1]  ;;  %v881_v6 = vsel %vm3837_vm6, 0.0, %v846_v44 }
  0x69   : > { %v882_v7 = vsel %vm3837_vm6, 0.0, %v847_v45  ;;  %v1171_v8 = vsel %vm1020_vm7, %v1170_v37, %v1169_v3  ;;  %v1149_v9 = vsel %vm1008_vm2, %v1148_v57, %v1147_v4  ;;  %v883_v10 = vsel %vm3837_vm6, 0.0, %v848_v50  ;;  %v838_v12 = vld [vmem:[%s3826_s16] sm:$0x1]  ;;  %v839_v13 = vld [vmem:[%s3826_s16 + $0x8] sm:$0x1] }
  0x6a   : > { %v884_v11 = vsel %vm3837_vm6, 0.0, %v849_v55  ;;  %v840_v14 = vld [vmem:[%s3826_s16 + $0x10] sm:$0x1]  ;;  %1178 = vrot.lane.b32.xlu0 %v1171_v8, %s3495_s15  ;;  %v1151_v15 = vsel %vm1011_vm3, %v1150_v58, %v1149_v9  ;;  %v885_v17 = vsel %vm3837_vm6, 0.0, %v850_v60  ;;  %v886_v18 = vsel %vm3837_vm6, 0.0, %v851_v1  ;;  %v701_v44 = vld [vmem:[%s3819_s6] sm:$0xff] }
  0x6b   : > { %v887_v19 = vsel %vm3837_vm6, 0.0, %v852_v2  ;;  %v841_v20 = vld [vmem:[%s3826_s16 + $0x18] sm:$0x1]  ;;  %v1153_v21 = vsel %vm1014_vm4, %v1152_v59, %v1151_v15  ;;  %v888_v22 = vsel %vm3837_vm6, 0.0, %v853_v5  ;;  %v1130_v23 = vrot.slane %v882_v7, 7  ;;  %s3501_s17 = smov 96  }
  0x6c   : > { %v1132_v24 = vrot.slane %v883_v10, 6  ;;  %v842_v26 = vld [vmem:[%s3826_s16 + $0x20] sm:$0x1]  ;;  %v1155_v27 = vsel %vm1017_vm5, %v1154_v63, %v1153_v21  ;;  %v1134_v28 = vrot.slane %v884_v11, 5  ;;  %v1136_v29 = vrot.slane %v885_v17, 4  ;;  %s3502_s19 = smov 111  }
  0x6d   : > { %v1138_v30 = vrot.slane %v886_v18, 3  ;;  %v843_v31 = vld [vmem:[%s3826_s16 + $0x28] sm:$0x1]  ;;  %v1157_v32 = vsel %vm1020_vm7, %v1156_v0, %v1155_v27  ;;  %v1131_v33 = vsel %vm1002_vm0, %v1130_v23, %v881_v6  ;;  %v1140_v34 = vrot.slane %v887_v19, 2  ;;  %v844_v36 = vld [vmem:[%s3826_s16 + $0x30] sm:$0x1] }
  0x6e   : > { %v1142_v35 = vrot.slane %v888_v22, 1  ;;  %v845_v37 = vld [vmem:[%s3826_s16 + $0x38] sm:$0x1]  ;;  %1176 = vrot.lane.b32.xlu1 %v1157_v32, %s3495_s15  ;;  %v1133_v38 = vsel %vm1005_vm1, %v1132_v24, %v1131_v33  ;;  %1074 = vrot.lane.b32.xlu0 %v702_v25, %s3495_s15  ;;  %v873_v39 = vsel %vm3837_vm6, 0.0, %v838_v12  ;;  %v874_v40 = vsel %vm3837_vm6, 0.0, %v839_v13  ;;  %s3503_s18 = smov 113  }
  0x6f   : > { %v875_v41 = vsel %vm3837_vm6, 0.0, %v840_v14  ;;  %v921_v42 = vld [vmem:[%s3826_s16 + $0x81] sm:$0x1]  ;;  %v1135_v43 = vsel %vm1008_vm2, %v1134_v28, %v1133_v38  ;;  %v876_v45 = vsel %vm3837_vm6, 0.0, %v841_v20  ;;  %v877_v46 = vsel %vm3837_vm6, 0.0, %v842_v26 }
  0x70   : > { %v878_v47 = vsel %vm3837_vm6, 0.0, %v843_v31  ;;  %v922_v48 = vld [vmem:[%s3826_s16 + $0x89] sm:$0x1]  ;;  %v923_v49 = vld [vmem:[%s3826_s16 + $0x91] sm:$0x1]  ;;  %v1137_v50 = vsel %vm1011_vm3, %v1136_v29, %v1135_v43  ;;  %v879_v51 = vsel %vm3837_vm6, 0.0, %v844_v36 }
  0x71   : > { %v880_v52 = vsel %vm3837_vm6, 0.0, %v845_v37  ;;  %v1116_v53 = vrot.slane %v874_v40, 7  ;;  %v924_v54 = vld [vmem:[%s3826_s16 + $0x99] sm:$0x1]  ;;  %v1139_v55 = vsel %vm1014_vm4, %v1138_v30, %v1137_v50  ;;  %v1118_v56 = vrot.slane %v875_v41, 6 }
  0x72   : > { %v1120_v57 = vrot.slane %v876_v45, 5  ;;  %v1122_v58 = vrot.slane %v877_v46, 4  ;;  %v925_v59 = vld [vmem:[%s3826_s16 + $0xa1] sm:$0x1]  ;;  %v1141_v60 = vsel %vm1017_vm5, %v1140_v34, %v1139_v55  ;;  %1072 = vrot.lane.b32.xlu0 %v701_v44, %s3495_s15  ;;  %v1124_v62 = vrot.slane %v878_v47, 3 }
  0x73   : > { %v1117_v61 = vsel %vm1002_vm0, %v1116_v53, %v873_v39  ;;  %v1126_v63 = vrot.slane %v879_v51, 2  ;;  %v926_v0 = vld [vmem:[%s3826_s16 + $0xa9] sm:$0x1]  ;;  %v927_v1 = vld [vmem:[%s3826_s16 + $0xb1] sm:$0x1]  ;;  %v1143_v2 = vsel %vm1020_vm7, %v1142_v35, %v1141_v60  ;;  %v1128_v4 = vrot.slane %v880_v52, 1 }
  0x74   : > { %v1119_v3 = vsel %vm1005_vm1, %v1118_v56, %v1117_v61  ;;  %v928_v5 = vld [vmem:[%s3826_s16 + $0xb9] sm:$0x1]  ;;  %v953_v6 = vsel %vm3837_vm6, 0.0, %v921_v42  ;;  %1174 = vrot.lane.b32.xlu1 %v1143_v2, %s3495_s15  ;;  %v954_v8 = vsel %vm3837_vm6, 0.0, %v922_v48  ;;  %v955_v9 = vsel %vm3837_vm6, 0.0, %v923_v49 }
  0x75   : > { %v1121_v7 = vsel %vm1008_vm2, %v1120_v57, %v1119_v3  ;;  %v956_v10 = vsel %vm3837_vm6, 0.0, %v924_v54  ;;  %v905_v11 = vld [vmem:[%s3826_s16 + $0x1] sm:$0x1]  ;;  %v906_v12 = vld [vmem:[%s3826_s16 + $0x9] sm:$0x1]  ;;  %v957_v15 = vsel %vm3837_vm6, 0.0, %v925_v59 }
  0x76   : > { %v907_v13 = vld [vmem:[%s3826_s16 + $0x11] sm:$0x1]  ;;  %v1123_v14 = vsel %vm1011_vm3, %v1122_v58, %v1121_v7  ;;  %v958_v17 = vsel %vm3837_vm6, 0.0, %v926_v0  ;;  %v959_v18 = vsel %vm3837_vm6, 0.0, %v927_v1  ;;  %v908_v19 = vld [vmem:[%s3826_s16 + $0x19] sm:$0x1] }
  0x77   : > { %v1125_v20 = vsel %vm1014_vm4, %v1124_v62, %v1123_v14  ;;  %v960_v21 = vsel %vm3837_vm6, 0.0, %v928_v5  ;;  %v1441_v22 = vrot.slane %v954_v8, 7  ;;  %v1443_v23 = vrot.slane %v955_v9, 6  ;;  %v909_v24 = vld [vmem:[%s3826_s16 + $0x21] sm:$0x1] }
  0x78   : > { %v1127_v25 = vsel %vm1017_vm5, %v1126_v63, %v1125_v20  ;;  %v1445_v26 = vrot.slane %v956_v10, 5  ;;  %v1447_v27 = vrot.slane %v957_v15, 4  ;;  %v1449_v28 = vrot.slane %v958_v17, 3  ;;  %v910_v29 = vld [vmem:[%s3826_s16 + $0x29] sm:$0x1] }
  0x79   : > { %v1129_v30 = vsel %vm1020_vm7, %v1128_v4, %v1127_v25  ;;  %v1442_v31 = vsel %vm1002_vm0, %v1441_v22, %v953_v6  ;;  %v1451_v32 = vrot.slane %v959_v18, 2  ;;  %v1453_v33 = vrot.slane %v960_v21, 1  ;;  %v911_v34 = vld [vmem:[%s3826_s16 + $0x31] sm:$0x1]  ;;  %v912_v35 = vld [vmem:[%s3826_s16 + $0x39] sm:$0x1] }
  0x7a   : > { %1172 = vrot.lane.b32.xlu1 %v1129_v30, %s3495_s15  ;;  %v1444_v36 = vsel %vm1005_vm1, %v1443_v23, %v1442_v31  ;;  %v937_v37 = vsel %vm3837_vm6, 0.0, %v905_v11  ;;  %v938_v38 = vsel %vm3837_vm6, 0.0, %v906_v12  ;;  %v939_v39 = vsel %vm3837_vm6, 0.0, %v907_v13  ;;  %v930_v0 = vld [vmem:[%s3826_s16 + $0xc9] sm:$0x1] }
  0x7b   : > { %v1446_v40 = vsel %vm1008_vm2, %v1445_v26, %v1444_v36  ;;  %v940_v41 = vsel %vm3837_vm6, 0.0, %v908_v19  ;;  %v941_v42 = vsel %vm3837_vm6, 0.0, %v909_v24  ;;  %v942_v43 = vsel %vm3837_vm6, 0.0, %v910_v29  ;;  %v931_v1 = vld [vmem:[%s3826_s16 + $0xd1] sm:$0x1] }
  0x7c   : > { %v1448_v44 = vsel %vm1011_vm3, %v1447_v27, %v1446_v40  ;;  %v943_v45 = vsel %vm3837_vm6, 0.0, %v911_v34  ;;  %v944_v46 = vsel %vm3837_vm6, 0.0, %v912_v35  ;;  %v1413_v47 = vrot.slane %v938_v38, 7  ;;  %v929_v2 = vld [vmem:[%s3826_s16 + $0xc1] sm:$0x1] }
  0x7d   : > { %v1450_v48 = vsel %vm1014_vm4, %v1449_v28, %v1448_v44  ;;  %v1415_v49 = vrot.slane %v939_v39, 6  ;;  %v1417_v50 = vrot.slane %v940_v41, 5  ;;  %v1419_v51 = vrot.slane %v941_v42, 4  ;;  %v932_v3 = vld [vmem:[%s3826_s16 + $0xd9] sm:$0x1] }
  0x7e   : > { %v1452_v52 = vsel %vm1017_vm5, %v1451_v32, %v1450_v48  ;;  %v1414_v53 = vsel %vm1002_vm0, %v1413_v47, %v937_v37  ;;  %v1421_v54 = vrot.slane %v942_v43, 3  ;;  %v1423_v57 = vrot.slane %v943_v45, 2  ;;  %v933_v4 = vld [vmem:[%s3826_s16 + $0xe1] sm:$0x1]  ;;  %v934_v5 = vld [vmem:[%s3826_s16 + $0xe9] sm:$0x1] }
  0x7f   : > { %v1454_v55 = vsel %vm1020_vm7, %v1453_v33, %v1452_v52  ;;  %v1416_v56 = vsel %vm1005_vm1, %v1415_v49, %v1414_v53  ;;  %v1425_v59 = vrot.slane %v944_v46, 1  ;;  %v935_v6 = vld [vmem:[%s3826_s16 + $0xf1] sm:$0x1]  ;;  %v936_v7 = vld [vmem:[%s3826_s16 + $0xf9] sm:$0x1]  ;;  %v962_v8 = vsel %vm3837_vm6, 0.0, %v930_v0 }
  0x80   : > { %1473 = vrot.lane.b32.xlu0 %v1454_v55, %s3495_s15  ;;  %v1418_v58 = vsel %vm1008_vm2, %v1417_v50, %v1416_v56  ;;  %v963_v9 = vsel %vm3837_vm6, 0.0, %v931_v1  ;;  %v964_v10 = vsel %vm3837_vm6, 0.0, %v932_v3  ;;  %v961_v11 = vsel %vm3837_vm6, 0.0, %v929_v2  ;;  %v913_v15 = vld [vmem:[%s3826_s16 + $0x41] sm:$0x1] }
  0x81   : > { %v1420_v60 = vsel %vm1011_vm3, %v1419_v51, %v1418_v58  ;;  %v965_v12 = vsel %vm3837_vm6, 0.0, %v933_v4  ;;  %v966_v13 = vsel %vm3837_vm6, 0.0, %v934_v5  ;;  %v967_v14 = vsel %vm3837_vm6, 0.0, %v935_v6  ;;  %v914_v20 = vld [vmem:[%s3826_s16 + $0x49] sm:$0x1] }
  0x82   : > { %v1422_v61 = vsel %vm1014_vm4, %v1421_v54, %v1420_v60  ;;  %v968_v17 = vsel %vm3837_vm6, 0.0, %v936_v7  ;;  %v1455_v18 = vrot.slane %v962_v8, 7  ;;  %v1457_v19 = vrot.slane %v963_v9, 6  ;;  %v915_v24 = vld [vmem:[%s3826_s16 + $0x51] sm:$0x1] }
  0x83   : > { %v1424_v62 = vsel %vm1017_vm5, %v1423_v57, %v1422_v61  ;;  %v1459_v21 = vrot.slane %v964_v10, 5  ;;  %v1461_v22 = vrot.slane %v965_v12, 4  ;;  %v1463_v23 = vrot.slane %v966_v13, 3  ;;  %v916_v28 = vld [vmem:[%s3826_s16 + $0x59] sm:$0x1] }
  0x84   : > { %v1426_v63 = vsel %vm1020_vm7, %v1425_v59, %v1424_v62  ;;  %v1456_v25 = vsel %vm1002_vm0, %v1455_v18, %v961_v11  ;;  %v1465_v26 = vrot.slane %v967_v14, 2  ;;  %v1467_v27 = vrot.slane %v968_v17, 1  ;;  %v917_v29 = vld [vmem:[%s3826_s16 + $0x61] sm:$0x1]  ;;  %v918_v31 = vld [vmem:[%s3826_s16 + $0x69] sm:$0x1] }
  0x85   : > { %1469 = vrot.lane.b32.xlu0 %v1426_v63, %s3495_s15  ;;  %v1458_v30 = vsel %vm1005_vm1, %v1457_v19, %v1456_v25  ;;  %v919_v32 = vld [vmem:[%s3826_s16 + $0x71] sm:$0x1]  ;;  %v920_v33 = vld [vmem:[%s3826_s16 + $0x79] sm:$0x1]  ;;  %v945_v35 = vsel %vm3837_vm6, 0.0, %v913_v15  ;;  %v946_v36 = vsel %vm3837_vm6, 0.0, %v914_v20 }
  0x86   : > { %v1460_v34 = vsel %vm1008_vm2, %v1459_v21, %v1458_v30  ;;  %v947_v37 = vsel %vm3837_vm6, 0.0, %v915_v24  ;;  %v948_v39 = vsel %vm3837_vm6, 0.0, %v916_v28  ;;  %v949_v40 = vsel %vm3837_vm6, 0.0, %v917_v29  ;;  %s738_s12 = scalar_select %p705_p4, 1, 0 }
  0x87   : > { %v1462_v38 = vsel %vm1011_vm3, %v1461_v22, %v1460_v34  ;;  %v950_v41 = vsel %vm3837_vm6, 0.0, %v918_v31  ;;  %v951_v43 = vsel %vm3837_vm6, 0.0, %v919_v32  ;;  %v952_v44 = vsel %vm3837_vm6, 0.0, %v920_v33  ;;  %v798_v63 = vld [vmem:[%s4098_s13 + $0xcf] sm:$0x1]  ;;  %s3154_s16 = sshll.u32 (%p3645_p12), %s3481_s28, 3 }
  0x88   : > { %v1464_v42 = vsel %vm1014_vm4, %v1463_v23, %v1462_v38  ;;  %v1427_v45 = vrot.slane %v946_v36, 7  ;;  %v1429_v47 = vrot.slane %v947_v37, 6  ;;  %v1431_v48 = vrot.slane %v948_v39, 5  ;;  %v790_v0 = vld [vmem:[%s4098_s13 + $0x8f] sm:$0x1] }
  0x89   : > { %v1466_v46 = vsel %vm1017_vm5, %v1465_v26, %v1464_v42  ;;  %v1433_v49 = vrot.slane %v949_v40, 4  ;;  %v1435_v52 = vrot.slane %v950_v41, 3  ;;  %v1437_v54 = vrot.slane %v951_v43, 2  ;;  %v799_v1 = vld [vmem:[%s4098_s13 + $0xd7] sm:$0x1] }
  0x8a   : > { %v1468_v50 = vsel %vm1020_vm7, %v1467_v27, %v1466_v46  ;;  %v1428_v51 = vsel %vm1002_vm0, %v1427_v45, %v945_v35  ;;  %v1439_v56 = vrot.slane %v952_v44, 1  ;;  %v739_v61 = vstv %s738_s12  ;;  %v797_v3 = vld [vmem:[%s4098_s13 + $0xc7] sm:$0x1]  ;;  %v791_v4 = vld [vmem:[%s4098_s13 + $0x97] sm:$0x1]  ;;  %s5308_s12 = sld [smem:[#allocation10_spill]] (%p3645_p12) }
  0x8b   : > { %1475 = vrot.lane.b32.xlu1 %v1468_v50, %s3495_s15  ;;  %v1430_v53 = vsel %vm1005_vm1, %v1429_v47, %v1428_v51  ;;  %vm4094_vm8 = vcmp.eq.s32.totalorder %v739_v61, 1  ;;  %v800_v6 = vld [vmem:[%s4098_s13 + $0xdf] sm:$0x1]  ;;  %v789_v9 = vld [vmem:[%s4098_s13 + $0x87] sm:$0x1]  ;;  %vm1184_vm9 = vcmask 130048  }
  0x8c   : > { %v1432_v55 = vsel %vm1008_vm2, %v1431_v48, %v1430_v53  ;;  %v830_v2 = vsel %vm4094_vm8, 0.0, %v798_v63  ;;  %v822_v5 = vsel %vm4094_vm8, 0.0, %v790_v0  ;;  %v831_v7 = vsel %vm4094_vm8, 0.0, %v799_v1  ;;  %v792_v11 = vld [vmem:[%s4098_s13 + $0x9f] sm:$0x1] }
  0x8d   : > { %v1434_v57 = vsel %vm1011_vm3, %v1433_v49, %v1432_v55  ;;  %v1050_v8 = vrot.slane %v830_v2, 7  ;;  %v829_v10 = vsel %vm4094_vm8, 0.0, %v797_v3  ;;  %v823_v12 = vsel %vm4094_vm8, 0.0, %v791_v4  ;;  %v801_v14 = vld [vmem:[%s4098_s13 + $0xe7] sm:$0x1] }
  0x8e   : > { %v1436_v58 = vsel %vm1014_vm4, %v1435_v52, %v1434_v57  ;;  %v1036_v13 = vrot.slane %v822_v5, 7  ;;  %v832_v15 = vsel %vm4094_vm8, 0.0, %v800_v6  ;;  %v1052_v17 = vrot.slane %v831_v7, 6  ;;  %v793_v20 = vld [vmem:[%s4098_s13 + $0xa7] sm:$0x1] }
  0x8f   : > { %v1438_v59 = vsel %vm1017_vm5, %v1437_v54, %v1436_v58  ;;  %v821_v18 = vsel %vm4094_vm8, 0.0, %v789_v9  ;;  %v1051_v19 = vsel %vm1002_vm0, %v1050_v8, %v829_v10  ;;  %v824_v21 = vsel %vm4094_vm8, 0.0, %v792_v11  ;;  %v802_v23 = vld [vmem:[%s4098_s13 + $0xef] sm:$0x1]  ;;  %v803_v31 = vld [vmem:[%s4098_s13 + $0xf7] sm:$0x1] }
  0x90   : > { %v1440_v60 = vsel %vm1020_vm7, %v1439_v56, %v1438_v59  ;;  %v1038_v22 = vrot.slane %v823_v12, 6  ;;  %v833_v24 = vsel %vm4094_vm8, 0.0, %v801_v14  ;;  %v1054_v25 = vrot.slane %v832_v15, 5  ;;  %v794_v28 = vld [vmem:[%s4098_s13 + $0xaf] sm:$0x1] }
  0x91   : > { %1471 = vrot.lane.b32.xlu1 %v1440_v60, %s3495_s15  ;;  %v1037_v26 = vsel %vm1002_vm0, %v1036_v13, %v821_v18  ;;  %v1053_v27 = vsel %vm1005_vm1, %v1052_v17, %v1051_v19  ;;  %v825_v29 = vsel %vm4094_vm8, 0.0, %v793_v20  ;;  %v1040_v30 = vrot.slane %v824_v21, 5  ;;  %v795_v36 = vld [vmem:[%s4098_s13 + $0xb7] sm:$0x1]  ;;  %v804_v39 = vld [vmem:[%s4098_s13 + $0xff] sm:$0x1] }
  0x92   : > { %v834_v32 = vsel %vm4094_vm8, 0.0, %v802_v23  ;;  %v1056_v33 = vrot.slane %v833_v24, 4  ;;  %v1039_v34 = vsel %vm1005_vm1, %v1038_v22, %v1037_v26  ;;  %v1055_v35 = vsel %vm1008_vm2, %v1054_v25, %v1053_v27  ;;  %v796_v44 = vld [vmem:[%s4098_s13 + $0xbf] sm:$0x1]  ;;  %v782_v51 = vld [vmem:[%s4098_s13 + $0x4f] sm:$0x1] }
  0x93   : > { %v826_v37 = vsel %vm4094_vm8, 0.0, %v794_v28  ;;  %v1042_v38 = vrot.slane %v825_v29, 4  ;;  %v835_v40 = vsel %vm4094_vm8, 0.0, %v803_v31  ;;  %v1058_v41 = vrot.slane %v834_v32, 3  ;;  %v783_v57 = vld [vmem:[%s4098_s13 + $0x57] sm:$0x1] }
  0x94   : > { %v1041_v42 = vsel %vm1008_vm2, %v1040_v30, %v1039_v34  ;;  %v1057_v43 = vsel %vm1011_vm3, %v1056_v33, %v1055_v35  ;;  %v827_v45 = vsel %vm4094_vm8, 0.0, %v795_v36  ;;  %v1044_v46 = vrot.slane %v826_v37, 3  ;;  %v781_v60 = vld [vmem:[%s4098_s13 + $0x47] sm:$0x1]  ;;  %v774_v61 = vld [vmem:[%s4098_s13 + $0xf] sm:$0x1] }
  0x95   : > { %v836_v47 = vsel %vm4094_vm8, 0.0, %v804_v39  ;;  %v1060_v48 = vrot.slane %v835_v40, 2  ;;  %v1043_v49 = vsel %vm1011_vm3, %v1042_v38, %v1041_v42  ;;  %v1059_v50 = vsel %vm1014_vm4, %v1058_v41, %v1057_v43  ;;  %v784_v1 = vld [vmem:[%s4098_s13 + $0x5f] sm:$0x1]  ;;  %v775_v5 = vld [vmem:[%s4098_s13 + $0x17] sm:$0x1] }
  0x96   : > { %v828_v52 = vsel %vm4094_vm8, 0.0, %v796_v44  ;;  %v1046_v53 = vrot.slane %v827_v45, 2  ;;  %v1062_v54 = vrot.slane %v836_v47, 1  ;;  %v1045_v55 = vsel %vm1014_vm4, %v1044_v46, %v1043_v49  ;;  %v773_v10 = vld [vmem:[%s4098_s13 + $0x7] sm:$0x1] }
  0x97   : > { %v1061_v56 = vsel %vm1017_vm5, %v1060_v48, %v1059_v50  ;;  %v814_v58 = vsel %vm4094_vm8, 0.0, %v782_v51  ;;  %v1048_v59 = vrot.slane %v828_v52, 1  ;;  %v815_v2 = vsel %vm4094_vm8, 0.0, %v783_v57  ;;  %v785_v12 = vld [vmem:[%s4098_s13 + $0x67] sm:$0x1] }
  0x98   : > { %v1047_v63 = vsel %vm1017_vm5, %v1046_v53, %v1045_v55  ;;  %v1063_v0 = vsel %vm1020_vm7, %v1062_v54, %v1061_v56  ;;  %v1022_v3 = vrot.slane %v814_v58, 7  ;;  %v813_v4 = vsel %vm4094_vm8, 0.0, %v781_v60  ;;  %v776_v17 = vld [vmem:[%s4098_s13 + $0x1f] sm:$0x1]  ;;  %v786_v22 = vld [vmem:[%s4098_s13 + $0x6f] sm:$0x1] }
  0x99   : > { %v806_v6 = vsel %vm4094_vm8, 0.0, %v774_v61  ;;  %v1049_v8 = vsel %vm1020_vm7, %v1048_v59, %v1047_v63  ;;  %v816_v13 = vsel %vm4094_vm8, 0.0, %v784_v1  ;;  %v1024_v14 = vrot.slane %v815_v2, 6  ;;  %v777_v26 = vld [vmem:[%s4098_s13 + $0x27] sm:$0x1] }
  0x9a   : > { %v1023_v15 = vsel %vm1002_vm0, %v1022_v3, %v813_v4  ;;  %v807_v18 = vsel %vm4094_vm8, 0.0, %v775_v5  ;;  %v1001_v19 = vrot.slane %v806_v6, 7  ;;  %v805_v21 = vsel %vm4094_vm8, 0.0, %v773_v10  ;;  %v787_v30 = vld [vmem:[%s4098_s13 + $0x77] sm:$0x1] }
  0x9b   : > { %v817_v23 = vsel %vm4094_vm8, 0.0, %v785_v12  ;;  %v1026_v24 = vrot.slane %v816_v13, 5  ;;  %v1025_v25 = vsel %vm1005_vm1, %v1024_v14, %v1023_v15  ;;  %v808_v27 = vsel %vm4094_vm8, 0.0, %v776_v17  ;;  %v778_v34 = vld [vmem:[%s4098_s13 + $0x2f] sm:$0x1] }
  0x9c   : > { %v1004_v28 = vrot.slane %v807_v18, 6  ;;  %v1003_v29 = vsel %vm1002_vm0, %v1001_v19, %v805_v21  ;;  %v818_v31 = vsel %vm4094_vm8, 0.0, %v786_v22  ;;  %v1028_v32 = vrot.slane %v817_v23, 4  ;;  %v788_v38 = vld [vmem:[%s4098_s13 + $0x7f] sm:$0x1] }
  0x9d   : > { %v1027_v33 = vsel %vm1008_vm2, %v1026_v24, %v1025_v25  ;;  %v809_v35 = vsel %vm4094_vm8, 0.0, %v777_v26  ;;  %v1007_v36 = vrot.slane %v808_v27, 5  ;;  %v819_v39 = vsel %vm4094_vm8, 0.0, %v787_v30  ;;  %v779_v42 = vld [vmem:[%s4098_s13 + $0x37] sm:$0x1] }
  0x9e   : > { %v1006_v37 = vsel %vm1005_vm1, %v1004_v28, %v1003_v29  ;;  %v1030_v40 = vrot.slane %v818_v31, 3  ;;  %v1029_v41 = vsel %vm1011_vm3, %v1028_v32, %v1027_v33  ;;  %v810_v43 = vsel %vm4094_vm8, 0.0, %v778_v34  ;;  %v780_v49 = vld [vmem:[%s4098_s13 + $0x3f] sm:$0x1]  ;;  %v731_v12 = vld [vmem:[%s4098_s13 + $0xce] sm:$0x1] }
  0x9f   : > { %v1010_v44 = vrot.slane %v809_v35, 4  ;;  %v1009_v45 = vsel %vm1008_vm2, %v1007_v36, %v1006_v37  ;;  %v820_v46 = vsel %vm4094_vm8, 0.0, %v788_v38  ;;  %v1032_v47 = vrot.slane %v819_v39, 2  ;;  %v732_v13 = vld [vmem:[%s4098_s13 + $0xd6] sm:$0x1] }
  0xa0   : > { %v1031_v48 = vsel %vm1014_vm4, %v1030_v40, %v1029_v41  ;;  %v811_v50 = vsel %vm4094_vm8, 0.0, %v779_v42  ;;  %v1013_v51 = vrot.slane %v810_v43, 3  ;;  %v1034_v53 = vrot.slane %v820_v46, 1  ;;  %v730_v15 = vld [vmem:[%s4098_s13 + $0xc6] sm:$0x1] }
  0xa1   : > { %v1012_v52 = vsel %vm1011_vm3, %v1010_v44, %v1009_v45  ;;  %v1033_v54 = vsel %vm1017_vm5, %v1032_v47, %v1031_v48  ;;  %v812_v55 = vsel %vm4094_vm8, 0.0, %v780_v49  ;;  %v1016_v56 = vrot.slane %v811_v50, 2  ;;  %v723_v17 = vld [vmem:[%s4098_s13 + $0x8e] sm:$0x1]  ;;  %v733_v18 = vld [vmem:[%s4098_s13 + $0xde] sm:$0x1] }
  0xa2   : > { %v1015_v58 = vsel %vm1014_vm4, %v1013_v51, %v1012_v52  ;;  %v1035_v59 = vsel %vm1020_vm7, %v1034_v53, %v1033_v54  ;;  %v1019_v60 = vrot.slane %v812_v55, 1  ;;  %v766_v14 = vsel %vm4094_vm8, 0.0, %v731_v12  ;;  %v724_v23 = vld [vmem:[%s4098_s13 + $0x96] sm:$0x1]  ;;  %v722_v25 = vld [vmem:[%s4098_s13 + $0x86] sm:$0x1] }
  0xa3   : > { %v1018_v61 = vsel %vm1017_vm5, %v1016_v56, %v1015_v58  ;;  %v767_v19 = vsel %vm4094_vm8, 0.0, %v732_v13  ;;  %v1294_v21 = vrot.slane %v766_v14, 7  ;;  %v765_v22 = vsel %vm4094_vm8, 0.0, %v730_v15  ;;  %v734_v26 = vld [vmem:[%s4098_s13 + $0xe6] sm:$0x1] }
  0xa4   : > { %v1021_v1 = vsel %vm1020_vm7, %v1019_v60, %v1018_v61  ;;  %v758_v24 = vsel %vm4094_vm8, 0.0, %v723_v17  ;;  %v768_v27 = vsel %vm4094_vm8, 0.0, %v733_v18  ;;  %v1296_v28 = vrot.slane %v767_v19, 6  ;;  %v725_v30 = vld [vmem:[%s4098_s13 + $0x9e] sm:$0x1] }
  0xa5   : > { %v1295_v29 = vsel %vm1002_vm0, %v1294_v21, %v765_v22  ;;  %v759_v31 = vsel %vm4094_vm8, 0.0, %v724_v23  ;;  %v1280_v32 = vrot.slane %v758_v24, 7  ;;  %v757_v33 = vsel %vm4094_vm8, 0.0, %v722_v25  ;;  %v735_v34 = vld [vmem:[%s4098_s13 + $0xee] sm:$0x1] }
  0xa6   : > { %v769_v35 = vsel %vm4094_vm8, 0.0, %v734_v26  ;;  %v1298_v36 = vrot.slane %v768_v27, 5  ;;  %v1297_v37 = vsel %vm1005_vm1, %v1296_v28, %v1295_v29  ;;  %v726_v38 = vld [vmem:[%s4098_s13 + $0xa6] sm:$0x1]  ;;  %v760_v39 = vsel %vm4094_vm8, 0.0, %v725_v30 }
  0xa7   : > { %v1282_v40 = vrot.slane %v759_v31, 6  ;;  %v1281_v41 = vsel %vm1002_vm0, %v1280_v32, %v757_v33  ;;  %v736_v42 = vld [vmem:[%s4098_s13 + $0xf6] sm:$0x1]  ;;  %v770_v43 = vsel %vm4094_vm8, 0.0, %v735_v34  ;;  %v1300_v44 = vrot.slane %v769_v35, 4 }
  0xa8   : > { %v1299_v45 = vsel %vm1008_vm2, %v1298_v36, %v1297_v37  ;;  %v727_v46 = vld [vmem:[%s4098_s13 + $0xae] sm:$0x1]  ;;  %v761_v47 = vsel %vm4094_vm8, 0.0, %v726_v38  ;;  %v1284_v48 = vrot.slane %v760_v39, 5  ;;  %v737_v51 = vld [vmem:[%s4098_s13 + $0xfe] sm:$0x1] }
  0xa9   : > { %v1283_v49 = vsel %vm1005_vm1, %v1282_v40, %v1281_v41  ;;  %v771_v52 = vsel %vm4094_vm8, 0.0, %v736_v42  ;;  %v1302_v53 = vrot.slane %v770_v43, 3  ;;  %v1301_v54 = vsel %vm1011_vm3, %v1300_v44, %v1299_v45  ;;  %v728_v55 = vld [vmem:[%s4098_s13 + $0xb6] sm:$0x1]  ;;  %v714_v21 = vld [vmem:[%s4098_s13 + $0x46] sm:$0x1] }
  0xaa   : > { %v762_v56 = vsel %vm4094_vm8, 0.0, %v727_v46  ;;  %v1285_v58 = vsel %vm1008_vm2, %v1284_v48, %v1283_v49  ;;  %v1304_v60 = vrot.slane %v771_v52, 2  ;;  %v716_v17 = vld [vmem:[%s4098_s13 + $0x56] sm:$0x1]  ;;  %v707_v22 = vld [vmem:[%s4098_s13 + $0xe] sm:$0x1] }
  0xab   : > { %v1303_v61 = vsel %vm1014_vm4, %v1302_v53, %v1301_v54  ;;  %v717_v25 = vld [vmem:[%s4098_s13 + $0x5e] sm:$0x1]  ;;  %v751_v26 = vsel %vm4094_vm8, 0.0, %v716_v17  ;;  %v749_v29 = vsel %vm4094_vm8, 0.0, %v714_v21  ;;  %v708_v30 = vld [vmem:[%s4098_s13 + $0x16] sm:$0x1] }
  0xac   : > { %v1305_v13 = vsel %vm1017_vm5, %v1304_v60, %v1303_v61  ;;  %v742_v31 = vsel %vm4094_vm8, 0.0, %v707_v22  ;;  %v706_v33 = vld [vmem:[%s4098_s13 + $0x6] sm:$0x1]  ;;  %v752_v36 = vsel %vm4094_vm8, 0.0, %v717_v25  ;;  %v1268_v37 = vrot.slane %v751_v26, 6 }
  0xad   : > { %v718_v35 = vld [vmem:[%s4098_s13 + $0x66] sm:$0x1]  ;;  %v709_v40 = vld [vmem:[%s4098_s13 + $0x1e] sm:$0x1]  ;;  %v743_v41 = vsel %vm4094_vm8, 0.0, %v708_v30  ;;  %v1252_v42 = vrot.slane %v742_v31, 7 }
  0xae   : > { %v741_v43 = vsel %vm4094_vm8, 0.0, %v706_v33  ;;  %v719_v45 = vld [vmem:[%s4098_s13 + $0x6e] sm:$0x1]  ;;  %v753_v46 = vsel %vm4094_vm8, 0.0, %v718_v35  ;;  %v744_v52 = vsel %vm4094_vm8, 0.0, %v709_v40  ;;  %v1254_v53 = vrot.slane %v743_v41, 6 }
  0xaf   : > { %v1253_v54 = vsel %vm1002_vm0, %v1252_v42, %v741_v43  ;;  %v1256_v61 = vrot.slane %v744_v52, 5  ;;  %v713_v22 = vld [vmem:[%s4098_s13 + $0x3e] sm:$0x1]  ;;  %vm1368_vm10 = vcmask 916480   ;;  %vm1567_vm11 = vcmask 252928  }
  0xb0   : > { %vm1554_vm12 = vcmask 1039360   ;;  %vm1507_vm15 = vcmask 7168  }
  0xcc   : > { %v4175_v7 = vpop.permute.xlu0 %1078  ;;  %v4178_v9 = vpop.permute.xlu1 %1076 }
  0xcd   : > { %v4183_v11 = vsel %vm1184_vm9, %v1063_v0, %v4175_v7  ;;  %v4196_v20 = vsel %vm1184_vm9, %v1049_v8, %v4178_v9 }
  0xce   : > { %1332 = vrot.lane.b32.xlu0 %v4183_v11, %s3495_s15 }
  0xd2   : > { %1328 = vrot.lane.b32.xlu0 %v4196_v20, %s3495_s15 }
  0xd6   : > { %1364 = vrot.lane.b32.xlu0 %v4183_v11, %s3496_s23 }
  0xdc   : > { %v1179_v57 = vpop.permute.xlu0 %1178 }
  0xdd   : > { %v4272_v5 = vsel %vm1184_vm9, %v4175_v7, %v1179_v57  ;;  %v1286_v57 = vrot.slane %v761_v47, 4  ;;  %v1270_v47 = vrot.slane %v752_v36, 5 }
  0xe0   : > { %v1075_v63 = vpop.permute.xlu0 %1074  ;;  %v1177_v4 = vpop.permute.xlu1 %1176 }
  0xe1   : > { %v4242_v0 = vsel %vm1184_vm9, %v1035_v59, %v1075_v63  ;;  %v4291_v7 = vsel %vm1184_vm9, %v4178_v9, %v1177_v4  ;;  %v772_v59 = vsel %vm4094_vm8, 0.0, %v737_v51  ;;  %v715_v4 = vld [vmem:[%s4098_s13 + $0x4e] sm:$0x1]  ;;  %v710_v51 = vld [vmem:[%s4098_s13 + $0x26] sm:$0x1] }
  0xe2   : > { %1324 = vrot.lane.b32.xlu1 %v4242_v0, %s3495_s15  ;;  %v1306_v12 = vrot.slane %v772_v59, 1  ;;  %v750_v18 = vsel %vm4094_vm8, 0.0, %v715_v4  ;;  %v711_v59 = vld [vmem:[%s4098_s13 + $0x2e] sm:$0x1]  ;;  %v745_v60 = vsel %vm4094_vm8, 0.0, %v710_v51 }
  0xe3   : > { %v1266_v27 = vrot.slane %v750_v18, 7 }
  0xe4   : > { %v1073_v2 = vpop.permute.xlu0 %1072  ;;  %v1307_v23 = vsel %vm1020_vm7, %v1306_v12, %v1305_v13  ;;  %v712_v13 = vld [vmem:[%s4098_s13 + $0x36] sm:$0x1] }
  0xe5   : > { %v4248_v3 = vsel %vm1184_vm9, %v1021_v1, %v1073_v2  ;;  %v763_v1 = vsel %vm4094_vm8, 0.0, %v728_v55  ;;  %v1267_v39 = vsel %vm1002_vm0, %v1266_v27, %v749_v29  ;;  %v720_v55 = vld [vmem:[%s4098_s13 + $0x76] sm:$0x1]  ;;  %v748_v29 = vsel %vm4094_vm8, 0.0, %v713_v22 }
  0xe6   : > { %1360 = vrot.lane.b32.xlu1 %v4196_v20, %s3496_s23  ;;  %1320 = vrot.lane.b32.xlu0 %v4248_v3, %s3495_s15  ;;  %v1175_v6 = vpop.permute.xlu1 %1174  ;;  %v1290_v15 = vrot.slane %v763_v1, 2  ;;  %v1269_v49 = vsel %vm1005_vm1, %v1268_v37, %v1267_v39  ;;  %v755_v4 = vsel %vm4094_vm8, 0.0, %v720_v55  ;;  %v1264_v35 = vrot.slane %v748_v29, 1 }
  0xe7   : > { %v4279_v8 = vsel %vm1184_vm9, %v1075_v63, %v1175_v6  ;;  %v729_v63 = vld [vmem:[%s4098_s13 + $0xbe] sm:$0x1]  ;;  %v1287_v6 = vsel %vm1011_vm3, %v1286_v57, %v1285_v58  ;;  %v1272_v57 = vrot.slane %v753_v46, 4  ;;  %v1271_v58 = vsel %vm1008_vm2, %v1270_v47, %v1269_v49 }
  0xe8   : > { %v764_v14 = vsel %vm4094_vm8, 0.0, %v729_v63  ;;  %v1255_v63 = vsel %vm1005_vm1, %v1254_v53, %v1253_v54  ;;  %v3499_v53 = vmov 0.0   ;;  %v1193_v54 = vlaneseq }
  0xe9   : > { %v1292_v24 = vrot.slane %v764_v14, 1  ;;  %v1273_v12 = vsel %vm1011_vm3, %v1272_v57, %v1271_v58  ;;  %v746_v14 = vsel %vm4094_vm8, 0.0, %v711_v59  ;;  %v1257_v17 = vsel %vm1008_vm2, %v1256_v61, %v1255_v63  ;;  %1750 = vmatprep.mubr.f32.mxu0 %v3499_v53  ;;  %1851 = vmatprep.mubr.f32.mxu1 %v3499_v53 }
  0xea   : > { %1352 = vrot.lane.b32.xlu1 %v4248_v3, %s3496_s23  ;;  %1356 = vrot.lane.b32.xlu0 %v4242_v0, %s3496_s23  ;;  %v4496_v57 = vand.u32 127, %v1193_v54  ;;  %vm1673_vm2 = vcmask 785408  }
  0xec   : > { %v1173_v10 = vpop.permute.xlu1 %1172  ;;  %v4504_v61 = vadd.s32 128, %v4496_v57 }
  0xed   : > { %v4302_v9 = vsel %vm1184_vm9, %v1073_v2, %v1173_v10  ;;  %v1288_v2 = vrot.slane %v762_v56, 3  ;;  %v754_v56 = vsel %vm4094_vm8, 0.0, %v719_v45 }
  0xee   : > { %1640 = vrot.lane.b32.xlu1 %v4183_v11, %s3497_s8  ;;  %1600 = vrot.lane.b32.xlu0 %v4183_v11, %s3498_s20 }
  0xef   : > { %v1289_v19 = vsel %vm1014_vm4, %v1288_v2, %v1287_v6  ;;  %v721_v2 = vld [vmem:[%s4098_s13 + $0x7e] sm:$0x1]  ;;  %v1274_v6 = vrot.slane %v754_v56, 3 }
  0xf0   : > { %v1291_v28 = vsel %vm1017_vm5, %v1290_v15, %v1289_v19  ;;  %v1258_v15 = vrot.slane %v745_v60, 4  ;;  %v756_v18 = vsel %vm4094_vm8, 0.0, %v721_v2  ;;  %v1276_v19 = vrot.slane %v755_v4, 2 }
  0xf1   : > { %v1293_v38 = vsel %vm1020_vm7, %v1292_v24, %v1291_v28  ;;  %v1275_v21 = vsel %vm1014_vm4, %v1274_v6, %v1273_v12  ;;  %v1260_v24 = vrot.slane %v746_v14, 3  ;;  %v1278_v27 = vrot.slane %v756_v18, 1 }
  0xf2   : > { %1636 = vrot.lane.b32.xlu1 %v4196_v20, %s3497_s8  ;;  %1596 = vrot.lane.b32.xlu0 %v4196_v20, %s3498_s20  ;;  %v4360_v50 = vpop.permute.xlu0 %1473  ;;  %v1259_v25 = vsel %vm1011_vm3, %v1258_v15, %v1257_v17  ;;  %v1277_v28 = vsel %vm1017_vm5, %v1276_v19, %v1275_v21  ;;  %v1207_v6 = vand.u32 15, %v4504_v61  ;;  %v3500_v61 = vmov 0  }
  0xf3   : > { %v1261_v31 = vsel %vm1014_vm4, %v1260_v24, %v1259_v25  ;;  %v1279_v33 = vsel %vm1020_vm7, %v1278_v27, %v1277_v28  ;;  %3397 = vset.pattern.permute.xlu0 %v3500_v61  ;;  %3398 = vset.pattern.permute.xlu1 %v3500_v61  ;;  %vm2308_vm3 = vcmask 908288   ;;  %vm2275_vm4 = vcmask 924672  }
  0xf4   : > { %vm4523_vm13 = vcmp.ne.s32.totalorder %v1207_v6, 15  ;;  %vm4616_vm0 = vcmp.ne.s32.totalorder %v1207_v6, 0  ;;  %v2074_v6 = vld [vmem:[%s5283_s5] sm:$0xff] }
  0xf6   : > { %1632 = vrot.lane.b32.xlu1 %v4242_v0, %s3497_s8  ;;  %1592 = vrot.lane.b32.xlu0 %v4242_v0, %s3498_s20 }
  0xf7   : > { %v4378_v10 = vpop.permute.xlu0 %1469 }
  0xfa   : > { %1628 = vrot.lane.b32.xlu1 %v4248_v3, %s3497_s8  ;;  %1366 = vrot.lane.b32.xlu0 %v4272_v5, %s3496_s23 }
  0xfd   : > { %v1476_v1 = vpop.permute.xlu1 %1475 }
  0xfe   : > { %1588 = vrot.lane.b32.xlu1 %v4248_v3, %s3498_s20  ;;  %1326 = vrot.lane.b32.xlu0 %v4279_v8, %s3495_s15 }
 0x102   : > { %1334 = vrot.lane.b32.xlu1 %v4272_v5, %s3495_s15  ;;  %1358 = vrot.lane.b32.xlu0 %v4279_v8, %s3496_s23 }
 0x103   : > { %v4457_v26 = vpop.permute.xlu1 %1471 }
 0x106   : > { %1330 = vrot.lane.b32.xlu1 %v4291_v7, %s3495_s15  ;;  %1642 = vrot.lane.b32.xlu0 %v4272_v5, %s3497_s8 }
 0x10a   : > { %1362 = vrot.lane.b32.xlu1 %v4291_v7, %s3496_s23  ;;  %1638 = vrot.lane.b32.xlu0 %v4291_v7, %s3497_s8 }
 0x10e   : > { %1322 = vrot.lane.b32.xlu1 %v4302_v9, %s3495_s15  ;;  %1634 = vrot.lane.b32.xlu0 %v4279_v8, %s3497_s8  ;;  %s694_s15 = scalar_lea.vmem [#allocation5], %s3815_s9  ;;  %s2776_s9 = sadd.s32 (%p3645_p12), %s3477_s27, %s3154_s16 }
 0x10f   : > { %s3155_s21 = sshll.u32 (%p3645_p12), %s2776_s9, 3 }
 0x112   : > { %1354 = vrot.lane.b32.xlu1 %v4302_v9, %s3496_s23  ;;  %1630 = vrot.lane.b32.xlu0 %v4302_v9, %s3497_s8 }
 0x116   : > { %1602 = vrot.lane.b32.xlu1 %v4272_v5, %s3498_s20  ;;  %1590 = vrot.lane.b32.xlu0 %v4302_v9, %s3498_s20 }
 0x11a   : > { %1598 = vrot.lane.b32.xlu1 %v4291_v7, %s3498_s20 }
 0x11e   : > { %1594 = vrot.lane.b32.xlu1 %v4279_v8, %s3498_s20 }
 0x140   : > { %v4399_v32 = vpop.permute.xlu0 %1332 }
 0x141   : > { %v4404_v34 = vsel %vm1184_vm9, %v1307_v23, %v4399_v32  ;;  %v747_v23 = vsel %vm4094_vm8, 0.0, %v712_v13  ;;  %v1200_v13 = vand.u32 15, %v4496_v57  ;;  %v2960_v57 = vld [vmem:[%s5281_s3 + $0x38] sm:$0xff] }
 0x142   : > { %1550 = vrot.lane.b32.xlu1 %v4404_v34, %s3497_s8  ;;  %v1262_v30 = vrot.slane %v747_v23, 2 }
 0x143   : > { %vm4527_vm14 = vcmp.ne.s32.totalorder %v1200_v13, 15  ;;  %vm4620_vm1 = vcmp.ne.s32.totalorder %v1200_v13, 0  ;;  %v3074_v13 = vld [vmem:[%s5283_s5 + $0x28] sm:$0xff] }
 0x144   : > { %v4418_v44 = vpop.permute.xlu0 %1328  ;;  %v1263_v36 = vsel %vm1017_vm5, %v1262_v30, %v1261_v31 }
 0x145   : > { %v4425_v48 = vsel %vm1184_vm9, %v1293_v38, %v4418_v44  ;;  %v1265_v40 = vsel %vm1020_vm7, %v1264_v35, %v1263_v36 }
 0x146   : > { %1546 = vrot.lane.b32.xlu0 %v4425_v48, %s3497_s8 }
 0x148   : > { %v1365_v37 = vpop.permute.xlu0 %1364 }
 0x154   : > { %v1325_v38 = vpop.permute.xlu1 %1324 }
 0x155   : > { %v4466_v39 = vsel %vm1184_vm9, %v1279_v33, %v1325_v38 }
 0x156   : > { %1542 = vrot.lane.b32.xlu0 %v4466_v39, %s3497_s8 }
 0x158   : > { %v1361_v41 = vpop.permute.xlu1 %1360  ;;  %v1321_v42 = vpop.permute.xlu0 %1320 }
 0x159   : > { %v4472_v43 = vsel %vm1184_vm9, %v1265_v40, %v1321_v42 }
 0x15a   : > { %1538 = vrot.lane.b32.xlu0 %v4472_v43, %s3497_s8 }
 0x15c   : > { %v4476_v45 = vpop.permute.xlu1 %1352  ;;  %v4478_v46 = vpop.permute.xlu0 %1356 }
 0x15e   : > { %1503 = vrot.lane.b32.xlu0 %v4404_v34, %s3498_s20 }
 0x160   : > { %v1641_v47 = vpop.permute.xlu1 %1640  ;;  %v4482_v49 = vpop.permute.xlu0 %1600 }
 0x162   : > { %1499 = vrot.lane.b32.xlu0 %v4425_v48, %s3498_s20 }
 0x164   : > { %v1637_v51 = vpop.permute.xlu1 %1636  ;;  %v4486_v52 = vpop.permute.xlu0 %1596 }
 0x166   : > { %1495 = vrot.lane.b32.xlu0 %v4466_v39, %s3498_s20 }
 0x168   : > { %v1633_v55 = vpop.permute.xlu1 %1632  ;;  %v4492_v56 = vpop.permute.xlu0 %1592 }
 0x16a   : > { %1491 = vrot.lane.b32.xlu0 %v4472_v43, %s3498_s20 }
 0x16c   : > { %v1629_v58 = vpop.permute.xlu1 %1628  ;;  %v1367_v59 = vpop.permute.xlu0 %1366 }
 0x16d   : > { %v4499_v60 = vsel %vm1184_vm9, %v1367_v59, %v1476_v1  ;;  %v4509_v4 = vsel %vm1368_vm10, %v1365_v37, %v1367_v59  ;;  %v2076_v59 = vld [vmem:[%s5283_s5 + $0x10] sm:$0xff] }
 0x16e   : > { %1934 = vrot.lane.b32.xlu1 %v4499_v60, %s3497_s8 }
 0x170   : > { %v4506_v63 = vpop.permute.xlu1 %1588  ;;  %v1327_v2 = vpop.permute.xlu0 %1326 }
 0x171   : > { %v1616_v54 = vsel %vm1507_vm15, 0.0, %v4506_v63 }
 0x172   : > { %1932 = vrot.lane.b32.xlu1 %v4509_v4, %s3497_s8 }
 0x174   : > { %v1335_v1 = vpop.permute.xlu1 %1334  ;;  %v1359_v12 = vpop.permute.xlu0 %1358 }
 0x175   : > { %v4517_v14 = vsel %vm1184_vm9, %v4399_v32, %v1335_v1  ;;  %v4582_v40 = vsel %vm1184_vm9, %v1359_v12, %v4457_v26  ;;  %v4600_v26 = vsel %vm1368_vm10, %v4478_v46, %v1359_v12  ;;  %v3075_v1 = vld [vmem:[%s5283_s5 + $0x30] sm:$0xff]  ;;  %v3073_v12 = vld [vmem:[%s5283_s5 + $0x20] sm:$0xff] }
 0x176   : > { %1552 = vrot.lane.b32.xlu0 %v4517_v14, %s3497_s8 }
 0x178   : > { %v1331_v17 = vpop.permute.xlu1 %1330  ;;  %v1643_v18 = vpop.permute.xlu0 %1642 }
 0x179   : > { %v4533_v32 = vsel %vm1184_vm9, %v4418_v44, %v1331_v17  ;;  %v1659_v21 = vsel %vm1567_vm11, %v1643_v18, 0.0  ;;  %v1647_v22 = vsel %vm1554_vm12, %v1641_v47, %v1643_v18  ;;  %v4548_v44 = vsel %vm1184_vm9, %v1325_v38, %v1327_v2  ;;  %v3076_v2 = vld [vmem:[%s5283_s5 + $0x38] sm:$0xff] }
 0x17a   : > { %1548 = vrot.lane.b32.xlu0 %v4533_v32, %s3497_s8  ;;  %2962 = vmatprep.subr.msk.mxu0 %vm4523_vm13, %v1659_v21 }
 0x17b   : > { %2964 = vmatpush1.msk.msra.mxu0 %vm4527_vm14, %v1647_v22 }
 0x17c   : > { %v1363_v23 = vpop.permute.xlu1 %1362  ;;  %v1639_v24 = vpop.permute.xlu0 %1638 }
 0x17d   : > { %v4545_v25 = vsel %vm1184_vm9, %v1363_v23, %v4360_v50  ;;  %v1658_v27 = vsel %vm1567_vm11, %v1639_v24, 0.0  ;;  %v1646_v28 = vsel %vm1554_vm12, %v1637_v51, %v1639_v24  ;;  %v4561_v30 = vsel %vm1368_vm10, %v1361_v41, %v1363_v23 }
 0x17e   : > { %1930 = vrot.lane.b32.xlu1 %v4545_v25, %s3497_s8  ;;  %1544 = vrot.lane.b32.xlu0 %v4548_v44, %s3497_s8 }
 0x17f   : > { %2966 = vmatprep.subr.msk.mxu0 %vm4523_vm13, %v1658_v27 }
 0x180   : > { %2968 = vmatpush1.msk.msra.mxu0 %vm4527_vm14, %v1646_v28  ;;  %v1323_v50 = vpop.permute.xlu1 %1322  ;;  %v1635_v29 = vpop.permute.xlu0 %1634 }
 0x181   : > { %v4564_v31 = vsel %vm1184_vm9, %v1321_v42, %v1323_v50  ;;  %v1657_v33 = vsel %vm1567_vm11, %v1635_v29, 0.0  ;;  %v1645_v35 = vsel %vm1554_vm12, %v1633_v55, %v1635_v29  ;;  %v2958_v55 = vld [vmem:[%s5281_s3 + $0x28] sm:$0xff] }
 0x182   : > { %1928 = vrot.lane.b32.xlu1 %v4561_v30, %s3497_s8  ;;  %1540 = vrot.lane.b32.xlu0 %v4564_v31, %s3497_s8 }
 0x183   : > { %2970 = vmatprep.subr.msk.mxu0 %vm4523_vm13, %v1657_v33 }
 0x184   : > { %2972 = vmatpush1.msk.msra.mxu0 %vm4527_vm14, %v1645_v35  ;;  %v1355_v36 = vpop.permute.xlu1 %1354  ;;  %v1631_v37 = vpop.permute.xlu0 %1630 }
 0x185   : > { %v4578_v38 = vsel %vm1184_vm9, %v1355_v36, %v4378_v10  ;;  %v1656_v41 = vsel %vm1567_vm11, %v1631_v37, 0.0  ;;  %v1644_v42 = vsel %vm1554_vm12, %v1629_v58, %v1631_v37  ;;  %v2077_v58 = vld [vmem:[%s5283_s5 + $0x18] sm:$0xff] }
 0x186   : > { %1922 = vrot.lane.b32.xlu0 %v4578_v38, %s3497_s8  ;;  %1926 = vrot.lane.b32.xlu1 %v4582_v40, %s3497_s8 }
 0x187   : > { %2974 = vmatprep.subr.msk.mxu0 %vm4523_vm13, %v1656_v41 }
 0x188   : > { %2976 = vmatpush1.msk.msra.mxu0 %vm4527_vm14, %v1644_v42  ;;  %v1603_v10 = vpop.permute.xlu1 %1602 }
 0x189   : > { %1702 = vmatprep.subr.mxu0 %v4272_v5  ;;  %v3034_v5 = vld [vmem:[%s5281_s3 + $0x48] sm:$0xff] }
 0x18a   : > { %1703 = vmatpush1.msra.mxu0 %v4183_v11  ;;  %1892 = vrot.lane.b32.xlu0 %v4509_v4, %s3498_s20  ;;  %v4612_v11 = vsel %vm1368_vm10, %v4476_v45, %v1355_v36 }
 0x18b   : > { %1924 = vrot.lane.b32.xlu1 %v4600_v26, %s3497_s8  ;;  %1704 = vmatprep.subr.mxu0 %v4291_v7  ;;  %v1619_v7 = vsel %vm1507_vm15, 0.0, %v4482_v49 }
 0x18c   : > { %1705 = vmatpush1.msra.mxu0 %v4196_v20  ;;  %v1599_v47 = vpop.permute.xlu1 %1598 }
 0x18d   : > { %1706 = vmatprep.subr.mxu0 %v4279_v8  ;;  %v1606_v45 = vsel %vm1507_vm15, %v4486_v52, %v1599_v47 }
 0x18e   : > { %1707 = vmatpush1.msra.mxu0 %v4242_v0  ;;  %1888 = vrot.lane.b32.xlu0 %v4561_v30, %s3498_s20  ;;  %v1607_v0 = vsel %vm1507_vm15, %v4482_v49, %v1603_v10  ;;  %v1617_v49 = vsel %vm1507_vm15, 0.0, %v4492_v56 }
 0x18f   : > { %1920 = vrot.lane.b32.xlu1 %v4612_v11, %s3497_s8  ;;  %1708 = vmatprep.subr.mxu0 %v4302_v9  ;;  %v1591_v9 = vpop.permute.xlu0 %1590 }
 0x190   : > { %1709 = vmatpush1.msra.mxu0 %v4248_v3  ;;  %v1595_v8 = vpop.permute.xlu1 %1594  ;;  %v1618_v3 = vsel %vm1507_vm15, 0.0, %v4486_v52  ;;  %v1604_v51 = vsel %vm1507_vm15, %v4506_v63, %v1591_v9  ;;  %v2957_v52 = vld [vmem:[%s5281_s3 + $0x20] sm:$0xff]  ;;  %v2075_v63 = vld [vmem:[%s5283_s5 + $0x8] sm:$0xff] }
 0x191   : > { %2978 = vmatprep.subr.msk.mxu0 %vm4616_vm0, %v1607_v0  ;;  %v1605_v46 = vsel %vm1507_vm15, %v4492_v56, %v1595_v8  ;;  %v2959_v56 = vld [vmem:[%s5281_s3 + $0x30] sm:$0xff] }
 0x192   : > { %2980 = vmatpush1.msk.msra.mxu0 %vm4620_vm1, %v1619_v7  ;;  %1884 = vrot.lane.b32.xlu0 %v4600_v26, %s3498_s20 }
 0x193   : > { %1505 = vrot.lane.b32.xlu1 %v4517_v14, %s3498_s20  ;;  %2982 = vmatprep.subr.msk.mxu0 %vm4616_vm0, %v1606_v45 }
 0x194   : > { %2984 = vmatpush1.msk.msra.mxu0 %vm4620_vm1, %v1618_v3 }
 0x195   : > { %2986 = vmatprep.subr.msk.mxu0 %vm4616_vm0, %v1605_v46 }
 0x196   : > { %2988 = vmatpush1.msk.msra.mxu0 %vm4620_vm1, %v1617_v49  ;;  %1880 = vrot.lane.b32.xlu0 %v4612_v11, %s3498_s20 }
 0x197   : > { %1501 = vrot.lane.b32.xlu1 %v4533_v32, %s3498_s20  ;;  %2990 = vmatprep.subr.msk.mxu0 %vm4616_vm0, %v1604_v51 }
 0x198   : > { %2992 = vmatpush1.msk.msra.mxu0 %vm4620_vm1, %v1616_v54 }
 0x199   : > { %2993 = vmatmul.mubr.msk.f32.vlgmr.msra.gmra.mxu0 %vm1673_vm2, %v2957_v52 }
 0x19a   : > { %1756 = vmatprep.mubr.f32.mxu0 %v3499_v53  ;;  %2095 = vperm.xlu0 %3397, %v2077_v58  }
 0x19b   : > { %1894 = vrot.lane.b32.xlu1 %v4499_v60, %s3498_s20 }
 0x19d   : > { %2994 = vmatmul.mubr.msk.f32.gmra.mxu0 %vm1673_vm2, %v2958_v55 }
 0x19e   : > { %1762 = vmatprep.mubr.f32.mxu0 %v3499_v53  ;;  %2085 = vperm.xlu0 %3397, %v2075_v63  }
 0x19f   : > { %1497 = vrot.lane.b32.xlu1 %v4548_v44, %s3498_s20 }
 0x1a1   : > { %2995 = vmatmul.mubr.msk.f32.gmra.mxu0 %vm1673_vm2, %v2959_v56 }
 0x1a2   : > { %1768 = vmatprep.mubr.f32.mxu0 %v3499_v53  ;;  %2080 = vperm.xlu0 %3397, %v2074_v6  }
 0x1a3   : > { %1890 = vrot.lane.b32.xlu1 %v4545_v25, %s3498_s20 }
 0x1a5   : > { %2996 = vmatmul.mubr.msk.f32.gmra.mxu0 %vm1673_vm2, %v2960_v57 }
 0x1a6   : > { %2041 = vmatprep.mubr.f32.mxu0 %v3499_v53  ;;  %2113 = vperm.xlu0 %3397, %v3073_v12   ;;  %v1584_v12 = vld [vmem:[%s5281_s3] sm:$0xff] }
 0x1a7   : > { %1493 = vrot.lane.b32.xlu1 %v4564_v31, %s3498_s20 }
 0x1ab   : > { %1886 = vrot.lane.b32.xlu1 %v4582_v40, %s3498_s20 }
 0x1af   : > { %1882 = vrot.lane.b32.xlu1 %v4578_v38, %s3498_s20 }
 0x1b3   : > { %2090 = vperm.xlu1 %3398, %v2076_v59  }
 0x1b4   : > { %v1551_v24 = vpop.permute.xlu1 %1550 }
 0x1b7   : > { %2128 = vperm.xlu1 %3398, %v3076_v2  }
 0x1b8   : > { %v1547_v17 = vpop.permute.xlu0 %1546 }
 0x1bb   : > { %2123 = vperm.xlu1 %3398, %v3075_v1  }
 0x1bf   : > { %2118 = vperm.xlu1 %3398, %v3074_v13  }
 0x1c8   : > { %v1543_v18 = vpop.permute.xlu0 %1542 }
 0x1cc   : > { %v1539_v21 = vpop.permute.xlu0 %1538 }
 0x1d0   : > { %v1504_v22 = vpop.permute.xlu0 %1503 }
 0x1d4   : > { %v4724_v23 = vpop.permute.xlu0 %1499 }
 0x1d5   : > { %v1522_v15 = vsel %vm1507_vm15, 0.0, %v4724_v23 }
 0x1d8   : > { %v4726_v27 = vpop.permute.xlu0 %1495 }
 0x1dc   : > { %v4731_v29 = vpop.permute.xlu0 %1491 }
 0x1dd   : > { %v1520_v13 = vsel %vm1507_vm15, 0.0, %v4731_v29 }
 0x1e0   : > { %v1935_v28 = vpop.permute.xlu1 %1934 }
 0x1e1   : > { %v1951_v50 = vsel %vm1567_vm11, %v1935_v28, 0.0 }
 0x1e2   : > { %3038 = vmatprep.subr.msk.mxu0 %vm4523_vm13, %v1951_v50  ;;  %v3033_v50 = vld [vmem:[%s5281_s3 + $0x40] sm:$0xff] }
 0x1e4   : > { %v1933_v33 = vpop.permute.xlu1 %1932 }
 0x1e5   : > { %v1939_v35 = vsel %vm1554_vm12, %v1933_v33, %v1935_v28  ;;  %v1586_v28 = vld [vmem:[%s5281_s3 + $0x10] sm:$0xff]  ;;  %v1587_v33 = vld [vmem:[%s5281_s3 + $0x18] sm:$0xff] }
 0x1e6   : > { %3040 = vmatpush1.msk.msra.mxu0 %vm4527_vm14, %v1939_v35  ;;  %v3035_v35 = vld [vmem:[%s5281_s3 + $0x50] sm:$0xff] }
 0x1e8   : > { %v1553_v36 = vpop.permute.xlu0 %1552 }
 0x1e9   : > { %v1571_v37 = vsel %vm1567_vm11, %v1553_v36, 0.0  ;;  %v1558_v41 = vsel %vm1554_vm12, %v1551_v24, %v1553_v36  ;;  %v3036_v36 = vld [vmem:[%s5281_s3 + $0x58] sm:$0xff] }
 0x1ea   : > { %2998 = vmatprep.subr.msk.mxu1 %vm4523_vm13, %v1571_v37 }
 0x1eb   : > { %3000 = vmatpush1.msk.msra.mxu1 %vm4527_vm14, %v1558_v41 }
 0x1ec   : > { %v1549_v42 = vpop.permute.xlu0 %1548 }
 0x1ed   : > { %v1557_v10 = vsel %vm1554_vm12, %v1547_v17, %v1549_v42  ;;  %v1570_v47 = vsel %vm1567_vm11, %v1549_v42, 0.0 }
 0x1ee   : > { %3002 = vmatprep.subr.msk.mxu1 %vm4523_vm13, %v1570_v47 }
 0x1ef   : > { %3004 = vmatpush1.msk.msra.mxu1 %vm4527_vm14, %v1557_v10 }
 0x1f0   : > { %v1931_v0 = vpop.permute.xlu1 %1930  ;;  %v1545_v8 = vpop.permute.xlu0 %1544 }
 0x1f1   : > { %v1950_v7 = vsel %vm1567_vm11, %v1931_v0, 0.0  ;;  %v1556_v45 = vsel %vm1554_vm12, %v1543_v18, %v1545_v8  ;;  %v1569_v9 = vsel %vm1567_vm11, %v1545_v8, 0.0 }
 0x1f2   : > { %3006 = vmatprep.subr.msk.mxu1 %vm4523_vm13, %v1569_v9  ;;  %3042 = vmatprep.subr.msk.mxu0 %vm4523_vm13, %v1950_v7 }
 0x1f3   : > { %3008 = vmatpush1.msk.msra.mxu1 %vm4527_vm14, %v1556_v45 }
 0x1f4   : > { %v1929_v3 = vpop.permute.xlu1 %1928  ;;  %v1541_v46 = vpop.permute.xlu0 %1540 }
 0x1f5   : > { %v1938_v49 = vsel %vm1554_vm12, %v1929_v3, %v1931_v0  ;;  %v1555_v51 = vsel %vm1554_vm12, %v1539_v21, %v1541_v46  ;;  %v1568_v52 = vsel %vm1567_vm11, %v1541_v46, 0.0  ;;  %v1585_v21 = vld [vmem:[%s5281_s3 + $0x8] sm:$0xff] }
 0x1f6   : > { %3010 = vmatprep.subr.msk.mxu1 %vm4523_vm13, %v1568_v52  ;;  %3044 = vmatpush1.msk.msra.mxu0 %vm4527_vm14, %v1938_v49 }
 0x1f7   : > { %3012 = vmatpush1.msk.msra.mxu1 %vm4527_vm14, %v1555_v51 }
 0x1f8   : > { %v1927_v54 = vpop.permute.xlu1 %1926  ;;  %1803 = vmatprep.subr.mxu1 %v4517_v14  ;;  %v1923_v56 = vpop.permute.xlu0 %1922 }
 0x1f9   : > { %v1949_v55 = vsel %vm1567_vm11, %v1927_v54, 0.0  ;;  %1804 = vmatpush1.msra.mxu1 %v4404_v34  ;;  %v1948_v14 = vsel %vm1567_vm11, %v1923_v56, 0.0 }
 0x1fa   : > { %1805 = vmatprep.subr.mxu1 %v4533_v32  ;;  %3046 = vmatprep.subr.msk.mxu0 %vm4523_vm13, %v1949_v55 }
 0x1fb   : > { %1806 = vmatpush1.msra.mxu1 %v4425_v48 }
 0x1fc   : > { %1807 = vmatprep.subr.mxu1 %v4548_v44 }
 0x1fd   : > { %v1925_v57 = vpop.permute.xlu1 %1924  ;;  %1808 = vmatpush1.msra.mxu1 %v4466_v39 }
 0x1fe   : > { %v1937_v58 = vsel %vm1554_vm12, %v1925_v57, %v1927_v54  ;;  %1809 = vmatprep.subr.mxu1 %v4564_v31 }
 0x1ff   : > { %3048 = vmatpush1.msk.msra.mxu0 %vm4527_vm14, %v1937_v58  ;;  %1810 = vmatpush1.msra.mxu1 %v4472_v43  ;;  %v1523_v43 = vsel %vm1507_vm15, 0.0, %v1504_v22 }
 0x200   : > { %3050 = vmatprep.subr.msk.mxu0 %vm4523_vm13, %v1948_v14 }
 0x201   : > { %v1921_v34 = vpop.permute.xlu1 %1920 }
 0x202   : > { %v1936_v48 = vsel %vm1554_vm12, %v1921_v34, %v1923_v56 }
 0x203   : > { %3052 = vmatpush1.msk.msra.mxu0 %vm4527_vm14, %v1936_v48 }
 0x204   : > { %1993 = vmatprep.subr.mxu0 %v4499_v60 }
 0x205   : > { %v1506_v39 = vpop.permute.xlu1 %1505  ;;  %1994 = vmatpush1.msra.mxu0 %v4509_v4 }
 0x206   : > { %v1511_v32 = vsel %vm1507_vm15, %v1504_v22, %v1506_v39  ;;  %1995 = vmatprep.subr.mxu0 %v4545_v25  ;;  %v1893_v25 = vpop.permute.xlu0 %1892 }
 0x207   : > { %3014 = vmatprep.subr.msk.mxu1 %vm4616_vm0, %v1511_v32  ;;  %1996 = vmatpush1.msra.mxu0 %v4561_v30  ;;  %v1911_v31 = vsel %vm1507_vm15, 0.0, %v1893_v25 }
 0x208   : > { %3016 = vmatpush1.msk.msra.mxu1 %vm4620_vm1, %v1523_v43  ;;  %1997 = vmatprep.subr.mxu0 %v4582_v40 }
 0x209   : > { %v1502_v60 = vpop.permute.xlu1 %1501  ;;  %1998 = vmatpush1.msra.mxu0 %v4600_v26  ;;  %v1521_v26 = vsel %vm1507_vm15, 0.0, %v4726_v27 }
 0x20a   : > { %v1510_v4 = vsel %vm1507_vm15, %v4724_v23, %v1502_v60  ;;  %1999 = vmatprep.subr.mxu0 %v4578_v38 }
 0x20b   : > { %3018 = vmatprep.subr.msk.mxu1 %vm4616_vm0, %v1510_v4  ;;  %2000 = vmatpush1.msra.mxu0 %v4612_v11  ;;  %v1889_v11 = vpop.permute.xlu0 %1888 }
 0x20c   : > { %3020 = vmatpush1.msk.msra.mxu1 %vm4620_vm1, %v1522_v15  ;;  %v1910_v63 = vsel %vm1507_vm15, 0.0, %v1889_v11 }
 0x20d   : > { %v1895_v44 = vpop.permute.xlu1 %1894 }
 0x20e   : > { %v1899_v30 = vsel %vm1507_vm15, %v1893_v25, %v1895_v44 }
 0x20f   : > { %3054 = vmatprep.subr.msk.mxu0 %vm4616_vm0, %v1899_v30  ;;  %v1885_v6 = vpop.permute.xlu0 %1884 }
 0x210   : > { %3056 = vmatpush1.msk.msra.mxu0 %vm4620_vm1, %v1911_v31  ;;  %v1909_v22 = vsel %vm1507_vm15, 0.0, %v1885_v6 }
 0x211   : > { %v1498_v38 = vpop.permute.xlu1 %1497 }
 0x212   : > { %v1509_v40 = vsel %vm1507_vm15, %v4726_v27, %v1498_v38 }
 0x213   : > { %3022 = vmatprep.subr.msk.mxu1 %vm4616_vm0, %v1509_v40  ;;  %v1881_v23 = vpop.permute.xlu0 %1880 }
 0x214   : > { %3024 = vmatpush1.msk.msra.mxu1 %vm4620_vm1, %v1521_v26 }
 0x215   : > { %v1891_v59 = vpop.permute.xlu1 %1890 }
 0x216   : > { %v1898_v61 = vsel %vm1507_vm15, %v1889_v11, %v1891_v59 }
 0x217   : > { %3058 = vmatprep.subr.msk.mxu0 %vm4616_vm0, %v1898_v61  ;;  %v4886_v47 = vpop.permute.xlu0 %2095 }
 0x218   : > { %3060 = vmatpush1.msk.msra.mxu0 %vm4620_vm1, %v1910_v63 }
 0x219   : > { %v1494_v2 = vpop.permute.xlu1 %1493 }
 0x21a   : > { %v1508_v1 = vsel %vm1507_vm15, %v4731_v29, %v1494_v2  ;;  %v1908_v29 = vsel %vm1507_vm15, 0.0, %v1881_v23 }
 0x21b   : > { %3026 = vmatprep.subr.msk.mxu1 %vm4616_vm0, %v1508_v1  ;;  %v2086_v45 = vpop.permute.xlu0 %2085 }
 0x21c   : > { %3028 = vmatpush1.msk.msra.mxu1 %vm4620_vm1, %v1520_v13 }
 0x21d   : > { %v1887_v17 = vpop.permute.xlu1 %1886  ;;  %3029 = vmatmul.mubr.msk.f32.vlgmr.msra.gmra.mxu1 %vm1673_vm2, %v1584_v12 }
 0x21e   : > { %v1897_v18 = vsel %vm1507_vm15, %v1885_v6, %v1887_v17  ;;  %1857 = vmatprep.mubr.f32.mxu1 %v3499_v53 }
 0x21f   : > { %3062 = vmatprep.subr.msk.mxu0 %vm4616_vm0, %v1897_v18  ;;  %v2081_v51 = vpop.permute.xlu0 %2080 }
 0x220   : > { %3064 = vmatpush1.msk.msra.mxu0 %vm4620_vm1, %v1909_v22 }
 0x221   : > { %v1883_v24 = vpop.permute.xlu1 %1882  ;;  %3030 = vmatmul.mubr.msk.f32.gmra.mxu1 %vm1673_vm2, %v1585_v21 }
 0x222   : > { %v1896_v27 = vsel %vm1507_vm15, %v1881_v23, %v1883_v24  ;;  %1863 = vmatprep.mubr.f32.mxu1 %v3499_v53 }
 0x223   : > { %3066 = vmatprep.subr.msk.mxu0 %vm4616_vm0, %v1896_v27  ;;  %v2114_v4 = vpop.permute.xlu0 %2113 }
 0x224   : > { %3068 = vmatpush1.msk.msra.mxu0 %vm4620_vm1, %v1908_v29 }
 0x225   : > { %3031 = vmatmul.mubr.msk.f32.gmra.mxu1 %vm1673_vm2, %v1586_v28  ;;  %3069 = vmatmul.mubr.msk.f32.vlgmr.msra.gmra.mxu0 %vm1673_vm2, %v3033_v50 }
 0x226   : > { %1869 = vmatprep.mubr.f32.mxu1 %v3499_v53  ;;  %2047 = vmatprep.mubr.f32.mxu0 %v3499_v53 }
 0x229   : > { %3032 = vmatmul.mubr.msk.f32.gmra.mxu1 %vm1673_vm2, %v1587_v33  ;;  %3070 = vmatmul.mubr.msk.f32.gmra.mxu0 %vm1673_vm2, %v3034_v5 }
 0x22a   : > { %2053 = vmatprep.mubr.f32.mxu0 %v3499_v53 }
 0x22d   : > { %3071 = vmatmul.mubr.msk.f32.gmra.mxu0 %vm1673_vm2, %v3035_v35 }
 0x22e   : > { %2059 = vmatprep.mubr.f32.mxu0 %v3499_v53  ;;  %v2091_v8 = vpop.permute.xlu1 %2090 }
 0x231   : > { %3072 = vmatmul.mubr.msk.f32.gmra.mxu0 %vm1673_vm2, %v3036_v36 }
 0x232   : > { %v4888_v53 = vpop.permute.xlu1 %2128 }
 0x236   : > { %v2124_v58 = vpop.permute.xlu1 %2123 }
 0x23a   : > { %v2119_v63 = vpop.permute.xlu1 %2118 }
 0x259   : > { %v1752_v37 = vpop.f32.mrf.mxu0 }
 0x25b   : > { %v1754_v41 = vpop.f32.mrf.mxu0 }
 0x25d   : > { %v1758_v42 = vpop.f32.mrf.mxu0 }
 0x25f   : > { %v1760_v10 = vpop.f32.mrf.mxu0 }
 0x261   : > { %v1764_v0 = vpop.f32.mrf.mxu0 }
 0x263   : > { %v1766_v7 = vpop.f32.mrf.mxu0 }
 0x265   : > { %v1770_v3 = vpop.f32.mrf.mxu0 }
 0x267   : > { %v1772_v52 = vpop.f32.mrf.mxu0 }
 0x2dd   : > { %v1853_v9 = vpop.f32.mrf.mxu1 }
 0x2de   : > { %v1854_v55 = vadd.f32 %v1853_v9, %v1752_v37 }
 0x2df   : > { %v1855_v46 = vpop.f32.mrf.mxu1 }
 0x2e0   : > { %v1856_v14 = vadd.f32 %v1855_v46, %v1754_v41 }
 0x2e1   : > { %v1859_v49 = vpop.f32.mrf.mxu1 }
 0x2e2   : > { %v1860_v32 = vadd.f32 %v1859_v49, %v1758_v42 }
 0x2e3   : > { %v1861_v54 = vpop.f32.mrf.mxu1 }
 0x2e4   : > { %v1862_v31 = vadd.f32 %v1861_v54, %v1760_v10 }
 0x2e5   : > { %v1865_v56 = vpop.f32.mrf.mxu1  ;;  %v2043_v57 = vpop.f32.mrf.mxu0 }
 0x2e6   : > { %v2066_v34 = vadd.f32 %v2043_v57, %v1854_v55  ;;  %v1866_v26 = vadd.f32 %v1865_v56, %v1764_v0 }
 0x2e7   : > { %v1867_v48 = vpop.f32.mrf.mxu1  ;;  %v2045_v39 = vpop.f32.mrf.mxu0 }
 0x2e8   : > { %v2098_v43 = vmul.f32 %v2081_v51, %v2066_v34  ;;  %v2067_v60 = vadd.f32 %v2045_v39, %v1856_v14  ;;  %v1868_v1 = vadd.f32 %v1867_v48, %v1766_v7 }
 0x2e9   : > { %v2049_v15 = vpop.f32.mrf.mxu0  ;;  %v1871_v38 = vpop.f32.mrf.mxu1 }
 0x2ea   : > { %v2131_v25 = vadd.f32 %v2114_v4, %v2098_v43  ;;  %v2099_v44 = vmul.f32 %v2081_v51, %v2067_v60  ;;  %v2068_v30 = vadd.f32 %v2049_v15, %v1860_v32  ;;  %v1872_v23 = vadd.f32 %v1871_v38, %v1770_v3  ;;  %v3077_v32 = vld [vmem:[%s5282_s4 + $0x20] sm:$0xff] }
 0x2eb   : > { %v2051_v40 = vpop.f32.mrf.mxu0  ;;  %v1873_v18 = vpop.f32.mrf.mxu1  ;;  %3234 = vmatprep.mubr.msk.f32.mxu1 %vm1673_vm2, %v3077_v32 }
 0x2ec   : > { %v4890_v11 = vmax.f32 %v2131_v25, 0.0  ;;  %v2132_v59 = vadd.f32 %v2114_v4, %v2099_v44  ;;  %v2100_v61 = vmul.f32 %v2086_v45, %v2068_v30  ;;  %v2069_v2 = vadd.f32 %v2051_v40, %v1862_v31 }
 0x2ed   : > { %v2055_v6 = vpop.f32.mrf.mxu0  ;;  %v1874_v33 = vadd.f32 %v1873_v18, %v1772_v52 }
 0x2ee   : > { %v4892_v12 = vmax.f32 %v2132_v59, 0.0  ;;  %v2133_v13 = vadd.f32 %v2119_v63, %v2100_v61  ;;  %v2070_v17 = vadd.f32 %v2055_v6, %v1866_v26  ;;  %2167 = vrot.lane.b32.xlu0 %v4890_v11, %s3501_s17  ;;  %v2101_v21 = vmul.f32 %v2086_v45, %v2069_v2 }
 0x2ef   : > { %v2057_v22 = vpop.f32.mrf.mxu0  ;;  %v2147_v14 = vsel %vm4094_vm8, 0.0, %v4890_v11 }
 0x2f0   : > { %v2102_v24 = vmul.f32 %v2091_v8, %v2070_v17  ;;  %v2071_v27 = vadd.f32 %v2057_v22, %v1868_v1  ;;  %2169 = vrot.lane.b32.xlu1 %v4892_v12, %s3501_s17  ;;  %v2134_v28 = vadd.f32 %v2119_v63, %v2101_v21  ;;  %v4898_v29 = vmax.f32 %v2133_v13, 0.0  ;;  %v2255_v17 = vld [vmem:[%s5282_s4] sm:$0xff] }
 0x2f1   : > { %v2061_v50 = vpop.f32.mrf.mxu0  ;;  %v4969_v34 = vsel %vm1184_vm9, %v2147_v14, %v4890_v11  ;;  %3264 = vmatprep.mubr.msk.f32.mxu0 %vm1673_vm2, %v2255_v17  ;;  %v3151_v14 = vld [vmem:[%s5283_s5 + $0x70] sm:$0xff] }
 0x2f2   : > { %v2103_v5 = vmul.f32 %v2091_v8, %v2071_v27  ;;  %v2072_v35 = vadd.f32 %v2061_v50, %v1872_v23  ;;  %v2142_v36 = vmax.f32 %v2134_v28, 0.0  ;;  %v2135_v37 = vadd.f32 %v2124_v58, %v2102_v24 }
 0x2f3   : > { %v2063_v41 = vpop.f32.mrf.mxu0  ;;  %v2148_v57 = vsel %vm4094_vm8, 0.0, %v4898_v29 }
 0x2f4   : > { %v2136_v42 = vadd.f32 %v2124_v58, %v2103_v5  ;;  %v2073_v10 = vadd.f32 %v2063_v41, %v1874_v33  ;;  %2171 = vrot.lane.b32.xlu1 %v4898_v29, %s3501_s17  ;;  %2173 = vrot.lane.b32.xlu0 %v2142_v36, %s3501_s17  ;;  %v2104_v0 = vmul.f32 %v4886_v47, %v2072_v35  ;;  %v2143_v7 = vmax.f32 %v2135_v37, 0.0  ;;  %v3146_v41 = vld [vmem:[%s5283_s5 + $0x48] sm:$0xff] }
 0x2f5   : > { %v2152_v9 = vsel %vm3837_vm6, 0.0, %v2142_v36  ;;  %v4960_v58 = vsel %vm1184_vm9, %v2148_v57, %v4898_v29 }
 0x2f6   : > { %v2105_v45 = vmul.f32 %v4886_v47, %v2073_v10  ;;  %v2144_v8 = vmax.f32 %v2136_v42, 0.0  ;;  %v2137_v3 = vadd.f32 %v4888_v53, %v2104_v0  ;;  %v2149_v54 = vsel %vm4094_vm8, 0.0, %v2143_v7  ;;  %v3145_v0 = vld [vmem:[%s5283_s5 + $0x40] sm:$0xff] }
 0x2f7   : > { %v4951_v56 = vsel %vm1184_vm9, %v2149_v54, %v2143_v7 }
 0x2f8   : > { %2197 = vrot.lane.b32.xlu1 %v2152_v9, %s3501_s17  ;;  %2175 = vrot.lane.b32.xlu0 %v2143_v7, %s3501_s17  ;;  %v2138_v46 = vadd.f32 %v4888_v53, %v2105_v45  ;;  %v2153_v49 = vsel %vm3837_vm6, 0.0, %v2144_v8  ;;  %v2145_v47 = vmax.f32 %v2137_v3, 0.0  ;;  %v2151_v53 = vsel %vm3837_vm6, 0.0, %v4892_v12  ;;  %v3148_v45 = vld [vmem:[%s5283_s5 + $0x58] sm:$0xff]  ;;  %v3147_v3 = vld [vmem:[%s5283_s5 + $0x50] sm:$0xff] }
 0x2fa   : > { %v2146_v51 = vmax.f32 %v2138_v46, 0.0  ;;  %v2150_v16 = vsel %vm4094_vm8, 0.0, %v2145_v47 }
 0x2fb   : > { %v4946_v55 = vsel %vm1184_vm9, %v2150_v16, %v2145_v47  ;;  %v3152_v16 = vld [vmem:[%s5283_s5 + $0x78] sm:$0xff] }
 0x2fc   : > { %2177 = vrot.lane.b32.xlu1 %v2144_v8, %s3501_s17  ;;  %2199 = vrot.lane.b32.xlu0 %v2153_v49, %s3501_s17  ;;  %v2154_v52 = vsel %vm3837_vm6, 0.0, %v2146_v51  ;;  %v3150_v49 = vld [vmem:[%s5283_s5 + $0x68] sm:$0xff] }
 0x300   : > { %2179 = vrot.lane.b32.xlu1 %v2145_v47, %s3501_s17  ;;  %2181 = vrot.lane.b32.xlu0 %v2146_v51, %s3501_s17 }
 0x304   : > { %2201 = vrot.lane.b32.xlu1 %v2154_v52, %s3501_s17  ;;  %2195 = vrot.lane.b32.xlu0 %v2151_v53, %s3501_s17  ;;  %v3149_v52 = vld [vmem:[%s5283_s5 + $0x60] sm:$0xff] }
 0x308   : > { %2304 = vrot.lane.b32.xlu1 %v2145_v47, %s3502_s19  ;;  %2306 = vrot.lane.b32.xlu0 %v2146_v51, %s3502_s19 }
 0x30c   : > { %2300 = vrot.lane.b32.xlu1 %v2143_v7, %s3502_s19  ;;  %2302 = vrot.lane.b32.xlu0 %v2144_v8, %s3502_s19 }
 0x310   : > { %2296 = vrot.lane.b32.xlu1 %v4898_v29, %s3502_s19  ;;  %2298 = vrot.lane.b32.xlu0 %v2142_v36, %s3502_s19 }
 0x314   : > { %2292 = vrot.lane.b32.xlu1 %v4890_v11, %s3502_s19  ;;  %2294 = vrot.lane.b32.xlu0 %v4892_v12, %s3502_s19 }
 0x318   : > { %2337 = vrot.lane.b32.xlu1 %v2145_v47, %s3496_s23  ;;  %2339 = vrot.lane.b32.xlu0 %v2146_v51, %s3496_s23 }
 0x31c   : > { %2333 = vrot.lane.b32.xlu1 %v2143_v7, %s3496_s23  ;;  %2335 = vrot.lane.b32.xlu0 %v2144_v8, %s3496_s23 }
 0x320   : > { %2329 = vrot.lane.b32.xlu1 %v4898_v29, %s3496_s23  ;;  %2331 = vrot.lane.b32.xlu0 %v2142_v36, %s3496_s23 }
 0x324   : > { %2325 = vrot.lane.b32.xlu1 %v4890_v11, %s3496_s23  ;;  %2327 = vrot.lane.b32.xlu0 %v4892_v12, %s3496_s23 }
 0x328   : > { %2271 = vrot.lane.b32.xlu1 %v2145_v47, %s3503_s18  ;;  %2273 = vrot.lane.b32.xlu0 %v2146_v51, %s3503_s18 }
 0x32c   : > { %2267 = vrot.lane.b32.xlu1 %v2143_v7, %s3503_s18  ;;  %2269 = vrot.lane.b32.xlu0 %v2144_v8, %s3503_s18 }
 0x330   : > { %2263 = vrot.lane.b32.xlu1 %v4898_v29, %s3503_s18  ;;  %2265 = vrot.lane.b32.xlu0 %v2142_v36, %s3503_s18 }
 0x334   : > { %2259 = vrot.lane.b32.xlu1 %v4890_v11, %s3503_s18  ;;  %2261 = vrot.lane.b32.xlu0 %v4892_v12, %s3503_s18 }
 0x338   : > { %2241 = vrot.lane.b32.xlu1 %v4946_v55, %s3497_s8  ;;  %2239 = vrot.lane.b32.xlu0 %v4951_v56, %s3497_s8 }
 0x33c   : > { %2237 = vrot.lane.b32.xlu0 %v4960_v58, %s3497_s8 }
 0x340   : > { %2235 = vrot.lane.b32.xlu0 %v4969_v34, %s3497_s8 }
 0x360   : > { %v2168_v39 = vpop.permute.xlu0 %2167 }
 0x362   : > { %v2170_v48 = vpop.permute.xlu1 %2169 }
 0x363   : > { %v2183_v11 = vsel %vm1673_vm2, %v2168_v39, %v2170_v48 }
 0x366   : > { %v2172_v43 = vpop.permute.xlu1 %2171  ;;  %v2174_v60 = vpop.permute.xlu0 %2173 }
 0x367   : > { %v2184_v2 = vsel %vm1673_vm2, %v2172_v43, %v2174_v60 }
 0x36a   : > { %v2198_v4 = vpop.permute.xlu1 %2197  ;;  %v2176_v62 = vpop.permute.xlu0 %2175 }
 0x36b   : > { %v4997_v1 = vsel %vm1368_vm10, %v2184_v2, %v2198_v4  ;;  %v3078_v2 = vld [vmem:[%s5282_s4 + $0x28] sm:$0xff] }
 0x36e   : > { %v2178_v15 = vpop.permute.xlu1 %2177  ;;  %v2200_v44 = vpop.permute.xlu0 %2199 }
 0x36f   : > { %v2185_v25 = vsel %vm1673_vm2, %v2176_v62, %v2178_v15 }
 0x370   : > { %v4979_v30 = vsel %vm1368_vm10, %v2185_v25, %v2200_v44 }
 0x371   : > { %2576 = vrot.lane.b32.xlu1 %v4979_v30, %s3497_s8 }
 0x372   : > { %v2180_v31 = vpop.permute.xlu1 %2179  ;;  %v2182_v38 = vpop.permute.xlu0 %2181 }
 0x373   : > { %v2186_v40 = vsel %vm1673_vm2, %v2180_v31, %v2182_v38 }
 0x376   : > { %v2202_v26 = vpop.permute.xlu1 %2201  ;;  %v2196_v61 = vpop.permute.xlu0 %2195 }
 0x377   : > { %v4986_v59 = vsel %vm1368_vm10, %v2186_v40, %v2202_v26  ;;  %v4989_v63 = vsel %vm1368_vm10, %v2183_v11, %v2196_v61 }
 0x378   : > { %2578 = vrot.lane.b32.xlu1 %v4986_v59, %s3497_s8  ;;  %2572 = vrot.lane.b32.xlu0 %v4989_v63, %s3497_s8 }
 0x37a   : > { %v2305_v6 = vpop.permute.xlu1 %2304  ;;  %v2307_v12 = vpop.permute.xlu0 %2306 }
 0x37b   : > { %v2312_v13 = vsel %vm2308_vm3, %v2305_v6, %v2307_v12  ;;  %v3079_v12 = vld [vmem:[%s5282_s4 + $0x30] sm:$0xff] }
 0x37c   : > { %2574 = vrot.lane.b32.xlu1 %v4997_v1, %s3497_s8  ;;  %v2320_v18 = vsel %vm1554_vm12, %v2312_v13, 0.0  ;;  %2219 = vrot.lane.b32.xlu0 %v4951_v56, %s3498_s20 }
 0x37d   : > { %3210 = vmatprep.subr.msk.mxu1 %vm4527_vm14, %v2320_v18 }
 0x37e   : > { %v2301_v21 = vpop.permute.xlu1 %2300  ;;  %3211 = vmatpush3.msk.msra.mxu1 %vm4527_vm14, %v2320_v18  ;;  %v2303_v22 = vpop.permute.xlu0 %2302 }
 0x37f   : > { %v2311_v23 = vsel %vm2308_vm3, %v2301_v21, %v2303_v22  ;;  %v3080_v21 = vld [vmem:[%s5282_s4 + $0x38] sm:$0xff]  ;;  %v3121_v22 = vld [vmem:[%s5282_s4 + $0x40] sm:$0xff] }
 0x380   : > { %2221 = vrot.lane.b32.xlu1 %v4946_v55, %s3498_s20  ;;  %v2319_v24 = vsel %vm1554_vm12, %v2311_v23, 0.0  ;;  %2217 = vrot.lane.b32.xlu0 %v4960_v58, %s3498_s20 }
 0x381   : > { %3212 = vmatprep.subr.msk.mxu1 %vm4527_vm14, %v2319_v24 }
 0x382   : > { %v2297_v27 = vpop.permute.xlu1 %2296  ;;  %3213 = vmatpush3.msk.msra.mxu1 %vm4527_vm14, %v2319_v24  ;;  %v2299_v28 = vpop.permute.xlu0 %2298 }
 0x383   : > { %v2310_v50 = vsel %vm2308_vm3, %v2297_v27, %v2299_v28 }
 0x384   : > { %2556 = vrot.lane.b32.xlu1 %v4979_v30, %s3498_s20  ;;  %v2318_v29 = vsel %vm1554_vm12, %v2310_v50, 0.0  ;;  %2215 = vrot.lane.b32.xlu0 %v4969_v34, %s3498_s20 }
 0x385   : > { %3214 = vmatprep.subr.msk.mxu1 %vm4527_vm14, %v2318_v29 }
 0x386   : > { %v2293_v33 = vpop.permute.xlu1 %2292  ;;  %3215 = vmatpush3.msk.msra.mxu1 %vm4527_vm14, %v2318_v29  ;;  %v2295_v5 = vpop.permute.xlu0 %2294 }
 0x387   : > { %v2309_v35 = vsel %vm2308_vm3, %v2293_v33, %v2295_v5 }
 0x388   : > { %2558 = vrot.lane.b32.xlu1 %v4986_v59, %s3498_s20  ;;  %v2317_v36 = vsel %vm1554_vm12, %v2309_v35, 0.0  ;;  %2552 = vrot.lane.b32.xlu0 %v4989_v63, %s3498_s20 }
 0x389   : > { %3216 = vmatprep.subr.msk.mxu1 %vm4527_vm14, %v2317_v36 }
 0x38a   : > { %v2338_v37 = vpop.permute.xlu1 %2337  ;;  %3217 = vmatpush3.msk.msra.mxu1 %vm4527_vm14, %v2317_v36  ;;  %v2340_v42 = vpop.permute.xlu0 %2339 }
 0x38b   : > { %v2344_v10 = vsel %vm1368_vm10, %v2338_v37, %v2340_v42 }
 0x38c   : > { %2554 = vrot.lane.b32.xlu1 %v4997_v1, %s3498_s20  ;;  %3218 = vmatprep.subr.mxu1 %v2344_v10 }
 0x38d   : > { %2710 = vperm.xlu0 %3397, %v3146_v41   ;;  %3219 = vmatpush3.msra.mxu1 %v2344_v10 }
 0x38e   : > { %v2334_v7 = vpop.permute.xlu1 %2333  ;;  %v2336_v9 = vpop.permute.xlu0 %2335 }
 0x38f   : > { %v2343_v8 = vsel %vm1368_vm10, %v2334_v7, %v2336_v9  ;;  %v2256_v7 = vld [vmem:[%s5282_s4 + $0x8] sm:$0xff] }
 0x390   : > { %2705 = vperm.xlu1 %3398, %v3145_v0   ;;  %3220 = vmatprep.subr.mxu1 %v2343_v8 }
 0x391   : > { %2720 = vperm.xlu0 %3397, %v3148_v45   ;;  %3221 = vmatpush3.msra.mxu1 %v2343_v8  ;;  %v2258_v8 = vld [vmem:[%s5282_s4 + $0x18] sm:$0xff] }
 0x392   : > { %v2330_v46 = vpop.permute.xlu1 %2329  ;;  %v2332_v47 = vpop.permute.xlu0 %2331 }
 0x393   : > { %v2342_v51 = vsel %vm1368_vm10, %v2330_v46, %v2332_v47  ;;  %v3122_v47 = vld [vmem:[%s5282_s4 + $0x48] sm:$0xff] }
 0x394   : > { %2715 = vperm.xlu1 %3398, %v3147_v3   ;;  %3222 = vmatprep.subr.mxu1 %v2342_v51 }
 0x395   : > { %2739 = vperm.xlu0 %3397, %v3150_v49   ;;  %3223 = vmatpush3.msra.mxu1 %v2342_v51  ;;  %v3123_v51 = vld [vmem:[%s5282_s4 + $0x50] sm:$0xff] }
 0x396   : > { %v2326_v53 = vpop.permute.xlu1 %2325  ;;  %v2328_v54 = vpop.permute.xlu0 %2327 }
 0x397   : > { %v2341_v57 = vsel %vm1368_vm10, %v2326_v53, %v2328_v54 }
 0x398   : > { %2734 = vperm.xlu1 %3398, %v3149_v52   ;;  %3224 = vmatprep.subr.mxu1 %v2341_v57  ;;  %v3124_v52 = vld [vmem:[%s5282_s4 + $0x58] sm:$0xff] }
 0x399   : > { %2749 = vperm.xlu0 %3397, %v3152_v16   ;;  %3225 = vmatpush3.msra.mxu1 %v2341_v57 }
 0x39a   : > { %v2272_v48 = vpop.permute.xlu1 %2271  ;;  %v2274_v39 = vpop.permute.xlu0 %2273 }
 0x39b   : > { %v2279_v32 = vsel %vm2275_vm4, %v2272_v48, %v2274_v39 }
 0x39c   : > { %2744 = vperm.xlu1 %3398, %v3151_v14   ;;  %v2287_v43 = vsel %vm1507_vm15, 0.0, %v2279_v32 }
 0x39d   : > { %3226 = vmatprep.subr.msk.mxu1 %vm4620_vm1, %v2287_v43 }
 0x39e   : > { %v2268_v60 = vpop.permute.xlu1 %2267  ;;  %3227 = vmatpush3.msk.msra.mxu1 %vm4620_vm1, %v2287_v43  ;;  %v2270_v4 = vpop.permute.xlu0 %2269 }
 0x39f   : > { %v2278_v62 = vsel %vm2275_vm4, %v2268_v60, %v2270_v4 }
 0x3a0   : > { %v2286_v15 = vsel %vm1507_vm15, 0.0, %v2278_v62 }
 0x3a1   : > { %3228 = vmatprep.subr.msk.mxu1 %vm4620_vm1, %v2286_v15 }
 0x3a2   : > { %v2264_v25 = vpop.permute.xlu1 %2263  ;;  %3229 = vmatpush3.msk.msra.mxu1 %vm4620_vm1, %v2286_v15  ;;  %v2266_v44 = vpop.permute.xlu0 %2265 }
 0x3a3   : > { %v2277_v31 = vsel %vm2275_vm4, %v2264_v25, %v2266_v44 }
 0x3a4   : > { %v2285_v38 = vsel %vm1507_vm15, 0.0, %v2277_v31 }
 0x3a5   : > { %3230 = vmatprep.subr.msk.mxu1 %vm4620_vm1, %v2285_v38 }
 0x3a6   : > { %v2260_v40 = vpop.permute.xlu1 %2259  ;;  %3231 = vmatpush3.msk.msra.mxu1 %vm4620_vm1, %v2285_v38  ;;  %v2262_v26 = vpop.permute.xlu0 %2261 }
 0x3a7   : > { %v2276_v11 = vsel %vm2275_vm4, %v2260_v40, %v2262_v26 }
 0x3a8   : > { %v2284_v61 = vsel %vm1507_vm15, 0.0, %v2276_v11 }
 0x3a9   : > { %3232 = vmatprep.subr.msk.mxu1 %vm4620_vm1, %v2284_v61 }
 0x3aa   : > { %v2242_v6 = vpop.permute.xlu1 %2241  ;;  %3233 = vmatpush3.msk.msra.mxu1 %vm4620_vm1, %v2284_v61  ;;  %v2240_v17 = vpop.permute.xlu0 %2239 }
 0x3ab   : > { %v2250_v13 = vsel %vm1554_vm12, %v2242_v6, 0.0  ;;  %3235 = vmatmul.mubr.msk.f32.vlgmr.msra.gmra.mxu1 %vm1673_vm2, %v3078_v2  ;;  %v2249_v18 = vsel %vm1554_vm12, %v2240_v17, 0.0 }
 0x3ac   : > { %3240 = vmatprep.subr.msk.mxu0 %vm4527_vm14, %v2250_v13  ;;  %3237 = vmatprep.mubr.msk.f32.mxu1 %vm1673_vm2, %v3079_v12 }
 0x3ad   : > { %3241 = vmatpush3.msk.msra.mxu0 %vm4527_vm14, %v2250_v13 }
 0x3ae   : > { %3242 = vmatprep.subr.msk.mxu0 %vm4527_vm14, %v2249_v18  ;;  %v2238_v23 = vpop.permute.xlu0 %2237 }
 0x3af   : > { %3243 = vmatpush3.msk.msra.mxu0 %vm4527_vm14, %v2249_v18  ;;  %v2248_v24 = vsel %vm1554_vm12, %v2238_v23, 0.0  ;;  %3238 = vmatmul.mubr.msk.f32.gmra.mxu1 %vm1673_vm2, %v3080_v21  ;;  %v3399_v21 = vld [vmem:[%s3819_s6 + $0x8] sm:$0xff] }
 0x3b0   : > { %3244 = vmatprep.subr.msk.mxu0 %vm4527_vm14, %v2248_v24  ;;  %3294 = vmatprep.mubr.msk.f32.mxu1 %vm1673_vm2, %v3121_v22 }
 0x3b1   : > { %3245 = vmatpush3.msk.msra.mxu0 %vm4527_vm14, %v2248_v24 }
 0x3b2   : > { %v2236_v27 = vpop.permute.xlu0 %2235 }
 0x3b3   : > { %v2247_v28 = vsel %vm1554_vm12, %v2236_v27, 0.0 }
 0x3b4   : > { %3246 = vmatprep.subr.msk.mxu0 %vm4527_vm14, %v2247_v28 }
 0x3b5   : > { %3247 = vmatpush3.msk.msra.mxu0 %vm4527_vm14, %v2247_v28 }
 0x3b6   : > { %3248 = vmatprep.subr.mxu0 %v4946_v55 }
 0x3b7   : > { %3249 = vmatpush3.msra.mxu0 %v4946_v55 }
 0x3b8   : > { %3250 = vmatprep.subr.mxu0 %v4951_v56 }
 0x3b9   : > { %3251 = vmatpush3.msra.mxu0 %v4951_v56 }
 0x3ba   : > { %3252 = vmatprep.subr.mxu0 %v4960_v58 }
 0x3bb   : > { %3253 = vmatpush3.msra.mxu0 %v4960_v58 }
 0x3bc   : > { %3254 = vmatprep.subr.mxu0 %v4969_v34 }
 0x3bd   : > { %3255 = vmatpush3.msra.mxu0 %v4969_v34 }
 0x3e3   : > { %v2577_v50 = vpop.permute.xlu1 %2576 }
 0x3e4   : > { %v2586_v55 = vsel %vm1554_vm12, %v2577_v50, 0.0 }
 0x3ea   : > { %v2579_v29 = vpop.permute.xlu1 %2578  ;;  %v2573_v5 = vpop.permute.xlu0 %2572 }
 0x3eb   : > { %v2587_v33 = vsel %vm1554_vm12, %v2579_v29, 0.0  ;;  %v2584_v35 = vsel %vm1554_vm12, %v2573_v5, 0.0  ;;  %v3400_v29 = vld [vmem:[%s3819_s6] sm:$0xff] }
 0x3ec   : > { %3270 = vmatprep.subr.msk.mxu1 %vm4527_vm14, %v2587_v33 }
 0x3ed   : > { %3271 = vmatpush3.msk.msra.mxu1 %vm4527_vm14, %v2587_v33 }
 0x3ee   : > { %v2575_v56 = vpop.permute.xlu1 %2574  ;;  %3272 = vmatprep.subr.msk.mxu1 %vm4527_vm14, %v2586_v55  ;;  %v2220_v34 = vpop.permute.xlu0 %2219 }
 0x3ef   : > { %v2585_v58 = vsel %vm1554_vm12, %v2575_v56, 0.0  ;;  %3273 = vmatpush3.msk.msra.mxu1 %vm4527_vm14, %v2586_v55  ;;  %v2229_v42 = vsel %vm1507_vm15, 0.0, %v2220_v34  ;;  %v3401_v34 = vld [vmem:[%s3819_s6 + $0x18] sm:$0xff] }
 0x3f0   : > { %3274 = vmatprep.subr.msk.mxu1 %vm4527_vm14, %v2585_v58 }
 0x3f1   : > { %3275 = vmatpush3.msk.msra.mxu1 %vm4527_vm14, %v2585_v58 }
 0x3f2   : > { %v2222_v36 = vpop.permute.xlu1 %2221  ;;  %3276 = vmatprep.subr.msk.mxu1 %vm4527_vm14, %v2584_v35  ;;  %v2218_v41 = vpop.permute.xlu0 %2217 }
 0x3f3   : > { %v2230_v37 = vsel %vm1507_vm15, 0.0, %v2222_v36  ;;  %3277 = vmatpush3.msk.msra.mxu1 %vm4527_vm14, %v2584_v35  ;;  %v2228_v19 = vsel %vm1507_vm15, 0.0, %v2218_v41  ;;  %v3402_v41 = vld [vmem:[%s3819_s6 + $0x10] sm:$0xff]  ;;  %s2778_s6 = scalar_lea.vmem (%p3645_p12), %s5308_s12, %s3155_s21 }
 0x3f4   : > { %3256 = vmatprep.subr.msk.mxu0 %vm4620_vm1, %v2230_v37  ;;  %3278 = vmatprep.subr.mxu1 %v4986_v59 }
 0x3f5   : > { %3257 = vmatpush3.msk.msra.mxu0 %vm4620_vm1, %v2230_v37  ;;  %3279 = vmatpush3.msra.mxu1 %v4986_v59 }
 0x3f6   : > { %v2557_v10 = vpop.permute.xlu1 %2556  ;;  %3258 = vmatprep.subr.msk.mxu0 %vm4620_vm1, %v2229_v42  ;;  %3280 = vmatprep.subr.mxu1 %v4979_v30  ;;  %v2216_v0 = vpop.permute.xlu0 %2215 }
 0x3f7   : > { %3259 = vmatpush3.msk.msra.mxu0 %vm4620_vm1, %v2229_v42  ;;  %3281 = vmatpush3.msra.mxu1 %v4979_v30  ;;  %v2227_v59 = vsel %vm1507_vm15, 0.0, %v2216_v0  ;;  %v2257_v30 = vld [vmem:[%s5282_s4 + $0x10] sm:$0xff] }
 0x3f8   : > { %3260 = vmatprep.subr.msk.mxu0 %vm4620_vm1, %v2228_v19  ;;  %3282 = vmatprep.subr.mxu1 %v4997_v1 }
 0x3f9   : > { %3261 = vmatpush3.msk.msra.mxu0 %vm4620_vm1, %v2228_v19  ;;  %3283 = vmatpush3.msra.mxu1 %v4997_v1  ;;  %v2566_v1 = vsel %vm1507_vm15, 0.0, %v2557_v10 }
 0x3fa   : > { %v2559_v45 = vpop.permute.xlu1 %2558  ;;  %3262 = vmatprep.subr.msk.mxu0 %vm4620_vm1, %v2227_v59  ;;  %3284 = vmatprep.subr.mxu1 %v4989_v63  ;;  %v2553_v3 = vpop.permute.xlu0 %2552 }
 0x3fb   : > { %v2567_v9 = vsel %vm1507_vm15, 0.0, %v2559_v45  ;;  %3263 = vmatpush3.msk.msra.mxu0 %vm4620_vm1, %v2227_v59  ;;  %3285 = vmatpush3.msra.mxu1 %v4989_v63  ;;  %v2564_v49 = vsel %vm1507_vm15, 0.0, %v2553_v3 }
 0x3fc   : > { %3265 = vmatmul.mubr.msk.f32.vlgmr.msra.gmra.mxu0 %vm1673_vm2, %v2256_v7  ;;  %3286 = vmatprep.subr.msk.mxu1 %vm4620_vm1, %v2567_v9 }
 0x3fd   : > { %3287 = vmatpush3.msk.msra.mxu1 %vm4620_vm1, %v2567_v9  ;;  %3267 = vmatprep.mubr.msk.f32.mxu0 %vm1673_vm2, %v2257_v30 }
 0x3fe   : > { %v2555_v46 = vpop.permute.xlu1 %2554  ;;  %3288 = vmatprep.subr.msk.mxu1 %vm4620_vm1, %v2566_v1 }
 0x3ff   : > { %v2565_v63 = vsel %vm1507_vm15, 0.0, %v2555_v46  ;;  %3289 = vmatpush3.msk.msra.mxu1 %vm4620_vm1, %v2566_v1 }
 0x400   : > { %3268 = vmatmul.mubr.msk.f32.gmra.mxu0 %vm1673_vm2, %v2258_v8  ;;  %3290 = vmatprep.subr.msk.mxu1 %vm4620_vm1, %v2565_v63 }
 0x401   : > { %3291 = vmatpush3.msk.msra.mxu1 %vm4620_vm1, %v2565_v63 }
 0x402   : > { %3292 = vmatprep.subr.msk.mxu1 %vm4620_vm1, %v2564_v49 }
 0x403   : > { %3293 = vmatpush3.msk.msra.mxu1 %vm4620_vm1, %v2564_v49 }
 0x404   : > { %3295 = vmatmul.mubr.msk.f32.vlgmr.msra.gmra.mxu1 %vm1673_vm2, %v3122_v47 }
 0x405   : > { %3297 = vmatprep.mubr.msk.f32.mxu1 %vm1673_vm2, %v3123_v51 }
 0x408   : > { %3298 = vmatmul.mubr.msk.f32.gmra.mxu1 %vm1673_vm2, %v3124_v52  ;;  %v2711_v16 = vpop.permute.xlu0 %2710 }
 0x40b   : > { %v2706_v54 = vpop.permute.xlu1 %2705 }
 0x40c   : > { %v2721_v32 = vpop.permute.xlu0 %2720 }
 0x40f   : > { %v2716_v20 = vpop.permute.xlu1 %2715 }
 0x410   : > { %v2740_v15 = vpop.permute.xlu0 %2739 }
 0x413   : > { %v2735_v61 = vpop.permute.xlu1 %2734 }
 0x414   : > { %v2750_v28 = vpop.permute.xlu0 %2749 }
 0x417   : > { %v2745_v56 = vpop.permute.xlu1 %2744 }
 0x46b   : > { %v3236_v53 = vpop.f32.mrf.mxu1 }
 0x46d   : > { %v2432_v57 = vpop.f32.mrf.mxu1 }
 0x46f   : > { %v3239_v48 = vpop.f32.mrf.mxu1 }
 0x471   : > { %v2442_v43 = vpop.f32.mrf.mxu1 }
 0x4bc   : > { %v3266_v14 = vpop.f32.mrf.mxu0 }
 0x4bd   : > { %v2535_v4 = vadd.f32 %v3266_v14, %v3236_v53 }
 0x4be   : > { %v2529_v39 = vpop.f32.mrf.mxu0 }
 0x4bf   : > { %v2530_v25 = vadd.f32 %v2529_v39, %v2432_v57 }
 0x4c0   : > { %v3269_v60 = vpop.f32.mrf.mxu0 }
 0x4c1   : > { %v2545_v40 = vadd.f32 %v3269_v60, %v3239_v48 }
 0x4c2   : > { %v2539_v31 = vpop.f32.mrf.mxu0 }
 0x4c3   : > { %v2540_v6 = vadd.f32 %v2539_v31, %v2442_v43 }
 0x4c4   : > { %v3296_v62 = vpop.f32.mrf.mxu1 }
 0x4c5   : > { %v2695_v44 = vadd.f32 %v3296_v62, %v2535_v4 }
 0x4c6   : > { %v2675_v38 = vpop.f32.mrf.mxu1 }
 0x4c7   : > { %v2724_v26 = vmul.f32 %v2711_v16, %v2695_v44  ;;  %v2694_v11 = vadd.f32 %v2675_v38, %v2530_v25 }
 0x4c8   : > { %v3299_v2 = vpop.f32.mrf.mxu1 }
 0x4c9   : > { %v2753_v12 = vadd.f32 %v2740_v15, %v2724_v26  ;;  %v2723_v13 = vmul.f32 %v2706_v54, %v2694_v11  ;;  %v2697_v17 = vadd.f32 %v3299_v2, %v2545_v40 }
 0x4ca   : > { %v2685_v18 = vpop.f32.mrf.mxu1 }
 0x4cb   : > { %v2757_v22 = vadd.f32 %v3399_v21, %v2753_v12  ;;  %v2752_v23 = vadd.f32 %v2735_v61, %v2723_v13  ;;  %v2726_v24 = vmul.f32 %v2721_v32, %v2697_v17  ;;  %v2696_v27 = vadd.f32 %v2685_v18, %v2540_v6 }
 0x4cd   : > { %v2761_v50 = vmax.f32 %v2757_v22, 0.0  ;;  %v2756_v33 = vadd.f32 %v3400_v29, %v2752_v23  ;;  %v2755_v5 = vadd.f32 %v2750_v28, %v2726_v24  ;;  %v2725_v55 = vmul.f32 %v2716_v20, %v2696_v27 }
 0x4cf   : > { %2765 = vst [vmem:[%s694_s15 + $0x8] sm:$0xff] %v2761_v50  ;;  %v2760_v58 = vmax.f32 %v2756_v33, 0.0  ;;  %v2759_v35 = vadd.f32 %v3401_v34, %v2755_v5  ;;  %v2754_v36 = vadd.f32 %v2745_v56, %v2725_v55 }
 0x4d1   : > { %2764 = vst [vmem:[%s694_s15] sm:$0xff] %v2760_v58  ;;  %v2763_v37 = vmax.f32 %v2759_v35, 0.0  ;;  %v2758_v42 = vadd.f32 %v3402_v41, %v2754_v36  ;;  %2774 = sbr.rel (!%p3645_p12) target bundleno = 1246 (0x4de), region = 162 }
 0x4d3   : > { %2767 = vst [vmem:[%s694_s15 + $0x18] sm:$0xff] %v2763_v37  ;;  %v2762_v10 = vmax.f32 %v2758_v42, 0.0 }
 0x4d5   : > { %2766 = vst [vmem:[%s694_s15 + $0x10] sm:$0xff] %v2762_v10 }
 0x4d6   : > { %v2815_v0 = vld [vmem:[%s694_s15 + $0x8] sm:$0xff] }
 0x4d7   : > { %2816 = vst [vmem:[%s2778_s6 + $0x10] sm:$0xff] %v2815_v0 }
 0x4d8   : > { %v2813_v19 = vld [vmem:[%s694_s15] sm:$0xff] }
 0x4d9   : > { %2814 = vst [vmem:[%s2778_s6] sm:$0xff] %v2813_v19 }
 0x4da   : > { %v2819_v7 = vld [vmem:[%s694_s15 + $0x18] sm:$0xff] }
 0x4db   : > { %2820 = vst [vmem:[%s2778_s6 + $0x30] sm:$0xff] %v2819_v7 }
 0x4dc   : > { %v2817_v59 = vld [vmem:[%s694_s15 + $0x10] sm:$0xff] }
 0x4dd   : > { %2818 = vst [vmem:[%s2778_s6 + $0x20] sm:$0xff] %v2817_v59 }
 0x4de PF: > { %s16_s7 = sadd.s32 1, %s3493_s7   ;;  %s5309_s27 = sld [smem:[#allocation9_spill]] }
 0x4df   : > { %p13_p5 = scmp.ge.s32.totalorder %s16_s7, 6   ;;  %s5310_s28 = sld [smem:[#allocation8_spill]] }
 0x4e0   : > { %s5311_s11 = sld [smem:[#allocation6_spill]]  ;;  %s5313_s21 = smov %s3457_s22 }
 0x4e1   : > { %s5312_s10 = sld [smem:[#allocation7_spill]]  ;;  %s5314_s22 = smov %s3651_s14 }
 0x4e2   : > { %s5315_s23 = smov %s3465_s24  ;;  %s5317_s25 = smov %s3473_s26 }
 0x4e3   :  { %15 = sbr.rel (!%p13_p5) target bundleno = 8 (0x8), region = 254 }
 0x4e4   : > { %s5316_s24 = smov %s5309_s27  ;;  %s5319_s27 = smov %s3485_s29 }
 0x4e5   : > { %s5318_s26 = smov %s5310_s28  ;;  %s5320_s28 = smov %s3489_s30 }
 0x4e6   : > { %s5321_s29 = smov %s5311_s11 }
 0x4e7   : > { %s5322_s30 = smov %s5312_s10 }

</bundles_post_ra>
